<compile_context>
chip_gen: v6e
topology: v6e:2x2x1
jax: 0.10.0
libtpu: 0.0.40
codegen_flags: <defaults>
</compile_context>

<pallas_src>
import jax
import jax.numpy as jnp
from jax.experimental import pallas as pl
from jax.experimental.pallas import tpu as pltpu

HIDDEN = 256
OUT_PAD = 128              # lane-dense padded width of the final layer
VMEM_BUDGET = 44 << 20     # conservative working-set budget (v7x has 64 MiB physical)


def mlp_kernel(x_ref,
               w1_ref, b1_ref,
               w2_ref, b2_ref,
               w3_ref, b3_ref,
               w4_ref, b4_ref,
               w5_ref, b5_ref,
               o_ref):
    # All matmuls: bf16 operands, f32 accumulation on the MXU.
    # Bias-add + ReLU in f32, then recast to bf16 for the next MXU push.
    x = x_ref[...].astype(jnp.bfloat16)       # in-kernel cast (x arrives as f32)
    h = jnp.dot(x, w1_ref[...], preferred_element_type=jnp.float32)
    h = jnp.maximum(h + b1_ref[...], 0.0).astype(jnp.bfloat16)

    h = jnp.dot(h, w2_ref[...], preferred_element_type=jnp.float32)
    h = jnp.maximum(h + b2_ref[...], 0.0).astype(jnp.bfloat16)

    h = jnp.dot(h, w3_ref[...], preferred_element_type=jnp.float32)
    h = jnp.maximum(h + b3_ref[...], 0.0).astype(jnp.bfloat16)

    h = jnp.dot(h, w4_ref[...], preferred_element_type=jnp.float32)
    h = jnp.maximum(h + b4_ref[...], 0.0).astype(jnp.bfloat16)

    # Output layer, padded to OUT_PAD lanes (no activation) -> unmasked full-lane store.
    out = jnp.dot(h, w5_ref[...], preferred_element_type=jnp.float32) + b5_ref[...]
    o_ref[...] = out.astype(o_ref.dtype)


def _round_up(x, m):
    return ((x + m - 1) // m) * m


def _vmem_footprint(tb, state_dim):
    """Conservative VMEM working-set estimate in bytes for one grid step."""
    x_tile = 2 * tb * state_dim * 4            # f32 x tile, double-buffered
    out_tile = 2 * tb * OUT_PAD * 4            # f32 out tile, double-buffered
    w = (state_dim * HIDDEN + 3 * HIDDEN * HIDDEN + HIDDEN * OUT_PAD) * 2   # bf16
    b = (4 * HIDDEN + OUT_PAD) * 4                                           # f32
    weights = 2 * (w + b)                      # x2: assume double-buffer fallback
    acts = 4 * tb * HIDDEN * 4                 # rough in-flight activation working set
    return x_tile + out_tile + weights + acts


def _choose_tb(B, state_dim):
    """Batch tile: big enough to amortize the ~0.35us per-step overhead, small
    enough to fit VMEM, and never collapsing the grid to 1 step for B >= 256
    (keeps both v7x TensorCores busy)."""
    if B >= 1024:
        tb = 512
    elif B >= 256:
        tb = min(256, _round_up(pl.cdiv(B, 2), 8))
    else:
        tb = _round_up(max(B, 1), 8)
    while tb > 8 and _vmem_footprint(tb, state_dim) > VMEM_BUDGET:
        tb = max(8, _round_up(tb // 2, 8))
    return tb


def _build_call(B, state_dim, TB, vmem_limit, single_buffer_weights):
    x_spec = pl.BlockSpec((TB, state_dim), lambda i: (i, 0))
    out_spec = pl.BlockSpec((TB, OUT_PAD), lambda i: (i, 0))

    use_sb = single_buffer_weights and hasattr(pl, "Buffered")

    def resident(shape):
        # Full-array block, same block index every grid step -> stays
        # VMEM-resident across batch tiles; single-buffered when supported.
        if use_sb:
            return pl.BlockSpec(shape, lambda i: (0, 0),
                                pipeline_mode=pl.Buffered(buffer_count=1))
        return pl.BlockSpec(shape, lambda i: (0, 0))

    in_specs = [
        x_spec,
        resident((state_dim, HIDDEN)), resident((1, HIDDEN)),
        resident((HIDDEN, HIDDEN)), resident((1, HIDDEN)),
        resident((HIDDEN, HIDDEN)), resident((1, HIDDEN)),
        resident((HIDDEN, HIDDEN)), resident((1, HIDDEN)),
        resident((HIDDEN, OUT_PAD)), resident((1, OUT_PAD)),
    ]

    return pl.pallas_call(
        mlp_kernel,
        out_shape=jax.ShapeDtypeStruct((B, OUT_PAD), jnp.float32),
        grid=(pl.cdiv(B, TB),),
        in_specs=in_specs,
        out_specs=out_spec,
        compiler_params=pltpu.CompilerParams(
            dimension_semantics=("parallel",),   # batch grid: shards across v7x's 2 TCs
            vmem_limit_bytes=vmem_limit,
        ),
    )


def space_invaders_mlp(x_nchw, params):
    """x_nchw: [B, C, H, W] float32. params: dict of f32 weights/biases."""
    B = x_nchw.shape[0]
    x_flat = x_nchw.reshape(B, -1).astype(jnp.float32)  # same as torch .view(B, -1)
    state_dim = x_flat.shape[1]
    n_actions = params["w5"].shape[1]

    TB = _choose_tb(B, state_dim)
    vmem_limit = int(min(max(_vmem_footprint(TB, state_dim) + (6 << 20), 16 << 20),
                         56 << 20))

    # ---- weights: bf16; output layer zero-padded to lane-dense width -------
    w1 = params["w1"].astype(jnp.bfloat16)
    w2 = params["w2"].astype(jnp.bfloat16)
    w3 = params["w3"].astype(jnp.bfloat16)
    w4 = params["w4"].astype(jnp.bfloat16)
    w5 = jnp.zeros((HIDDEN, OUT_PAD), jnp.bfloat16).at[:, :n_actions].set(
        params["w5"].astype(jnp.bfloat16))
    b5 = jnp.zeros((1, OUT_PAD), jnp.float32).at[:, :n_actions].set(
        params["b5"].astype(jnp.float32))
    # Hidden biases stay f32 (added to the f32 accumulator before ReLU).
    b1 = params["b1"].astype(jnp.float32)
    b2 = params["b2"].astype(jnp.float32)
    b3 = params["b3"].astype(jnp.float32)
    b4 = params["b4"].astype(jnp.float32)

    args = (x_flat, w1, b1, w2, b2, w3, b3, w4, b4, w5, b5)

    try:
        out = _build_call(B, state_dim, TB, vmem_limit, True)(*args)
    except Exception:
        # Fallback: plain (double-buffered) resident weight specs.
        out = _build_call(B, state_dim, TB, vmem_limit, False)(*args)

    # Slice away output-lane padding (no batch padding: ragged last block,
    # OOB writes dropped by Pallas).
    return out[:, :n_actions]


def init_params(key, state_dim, n_actions, hidden=HIDDEN):
    """Deterministic init (uniform, fan-in scaled, like PyTorch default Linear init)."""
    dims = [(state_dim, hidden), (hidden, hidden), (hidden, hidden),
            (hidden, hidden), (hidden, n_actions)]
    params = {}
    for i, (fan_in, fan_out) in enumerate(dims, start=1):
        key, kw, kb = jax.random.split(key, 3)
        bound = 1.0 / jnp.sqrt(fan_in)
        params[f"w{i}"] = jax.random.uniform(
            kw, (fan_in, fan_out), jnp.float32, -bound, bound)
        # bias kept 2D (1, fan_out) for clean TPU layout; broadcasts over batch
        params[f"b{i}"] = jax.random.uniform(
            kb, (1, fan_out), jnp.float32, -bound, bound)
    return params


def reference_mlp_f32(x_nchw, params):
    """Plain-JAX f32 reference."""
    h = x_nchw.reshape(x_nchw.shape[0], -1)
    h = jnp.maximum(h @ params["w1"] + params["b1"], 0.0)
    h = jnp.maximum(h @ params["w2"] + params["b2"], 0.0)
    h = jnp.maximum(h @ params["w3"] + params["b3"], 0.0)
    h = jnp.maximum(h @ params["w4"] + params["b4"], 0.0)
    return h @ params["w5"] + params["b5"]


def reference_mlp_bf16(x_nchw, params):
    """Reference that mirrors the kernel's bf16-matmul / f32-accumulate scheme."""
    def layer(h, w, b, relu):
        o = jnp.dot(h.astype(jnp.bfloat16), w.astype(jnp.bfloat16),
                    preferred_element_type=jnp.float32) + b
        return jnp.maximum(o, 0.0) if relu else o
    h = x_nchw.reshape(x_nchw.shape[0], -1)
    h = layer(h, params["w1"], params["b1"], True)
    h = layer(h, params["w2"], params["b2"], True)
    h = layer(h, params["w3"], params["b3"], True)
    h = layer(h, params["w4"], params["b4"], True)
    return layer(h, params["w5"], params["b5"], False)


if __name__ == "__main__":
    key = jax.random.PRNGKey(0)
    k_x, k_p = jax.random.split(key)

    # Small shapes: batch=2, channels=4, spatial=16x16 -> state_dim = 4*16*16 = 1024
    B, C, H, W = 2, 4, 16, 16
    state_dim = C * H * W
    n_actions = 6  # Space Invaders action space

    x = jax.random.normal(k_x, (B, C, H, W), dtype=jnp.float32)
    params = init_params(k_p, state_dim, n_actions)

    out = space_invaders_mlp(x, params)
    out = jax.block_until_ready(out)
    assert out.shape == (B, n_actions)

    # Tight-ish check vs. a reference using the same bf16/f32 mixed precision.
    ref_bf16 = reference_mlp_bf16(x, params)
    assert jnp.allclose(out, ref_bf16, atol=1e-2, rtol=1e-2), "mismatch vs bf16 reference"

    # Loose check vs. the pure-f32 reference (bf16 weight quantization error).
    ref_f32 = reference_mlp_f32(x, params)
    assert jnp.allclose(out, ref_f32, atol=5e-2, rtol=5e-2), "mismatch vs f32 reference"

    print("KERNEL_OK")
</pallas_src>

<mosaic_0001>
module attributes {stable_mosaic.version = 11 : i64} {
  func.func @mlp_kernel(%arg0: i32, %arg1: memref<8x1024xf32, #tpu.memory_space<vmem>>, %arg2: memref<1024x256xbf16, #tpu.memory_space<vmem>>, %arg3: memref<1x256xf32, #tpu.memory_space<vmem>>, %arg4: memref<256x256xbf16, #tpu.memory_space<vmem>>, %arg5: memref<1x256xf32, #tpu.memory_space<vmem>>, %arg6: memref<256x256xbf16, #tpu.memory_space<vmem>>, %arg7: memref<1x256xf32, #tpu.memory_space<vmem>>, %arg8: memref<256x256xbf16, #tpu.memory_space<vmem>>, %arg9: memref<1x256xf32, #tpu.memory_space<vmem>>, %arg10: memref<256x128xbf16, #tpu.memory_space<vmem>>, %arg11: memref<1x128xf32, #tpu.memory_space<vmem>>, %arg12: memref<8x128xf32, #tpu.memory_space<vmem>>) attributes {dimension_semantics = [#tpu.dimension_semantics<parallel>], iteration_bounds = array<i64: 1>, scalar_prefetch = 0 : i64, scratch_operands = 0 : i64, tpu.core_type = #tpu.core_type<tc>, window_params = [{transform_indices = @transform_0, window_bounds = array<i64: 8, 1024>}, {pipeline_mode = #tpu.pipeline_mode<synchronous>, transform_indices = @transform_1, window_bounds = array<i64: 1024, 256>}, {pipeline_mode = #tpu.pipeline_mode<synchronous>, transform_indices = @transform_2, window_bounds = array<i64: 1, 256>}, {pipeline_mode = #tpu.pipeline_mode<synchronous>, transform_indices = @transform_3, window_bounds = array<i64: 256, 256>}, {pipeline_mode = #tpu.pipeline_mode<synchronous>, transform_indices = @transform_4, window_bounds = array<i64: 1, 256>}, {pipeline_mode = #tpu.pipeline_mode<synchronous>, transform_indices = @transform_5, window_bounds = array<i64: 256, 256>}, {pipeline_mode = #tpu.pipeline_mode<synchronous>, transform_indices = @transform_6, window_bounds = array<i64: 1, 256>}, {pipeline_mode = #tpu.pipeline_mode<synchronous>, transform_indices = @transform_7, window_bounds = array<i64: 256, 256>}, {pipeline_mode = #tpu.pipeline_mode<synchronous>, transform_indices = @transform_8, window_bounds = array<i64: 1, 256>}, {pipeline_mode = #tpu.pipeline_mode<synchronous>, transform_indices = @transform_9, window_bounds = array<i64: 256, 128>}, {pipeline_mode = #tpu.pipeline_mode<synchronous>, transform_indices = @transform_10, window_bounds = array<i64: 1, 128>}, {transform_indices = @transform_11, window_bounds = array<i64: 8, 128>}]} {
    %c0 = arith.constant 0 : index
    %c0_0 = arith.constant 0 : index
    %0 = vector.load %arg1[%c0, %c0_0] : memref<8x1024xf32, #tpu.memory_space<vmem>>, vector<8x1024xf32>
    %1 = arith.truncf %0 : vector<8x1024xf32> to vector<8x1024xbf16>
    %c0_1 = arith.constant 0 : index
    %c0_2 = arith.constant 0 : index
    %2 = vector.load %arg2[%c0_1, %c0_2] : memref<1024x256xbf16, #tpu.memory_space<vmem>>, vector<1024x256xbf16>
    %cst = arith.constant dense<0.000000e+00> : vector<8x256xf32>
    %3 = tpu.matmul %1, %2, %cst {dimension_numbers = #tpu.dot_dimension_numbers<[1], [0], [0], [1], [0, 0, 1, 1], [], []>} : vector<8x1024xbf16>, vector<1024x256xbf16>, vector<8x256xf32> -> vector<8x256xf32>
    %c0_3 = arith.constant 0 : index
    %c0_4 = arith.constant 0 : index
    %4 = vector.load %arg3[%c0_3, %c0_4] : memref<1x256xf32, #tpu.memory_space<vmem>>, vector<1x256xf32>
    %5 = vector.broadcast %4 : vector<1x256xf32> to vector<8x256xf32>
    %6 = arith.addf %3, %5 : vector<8x256xf32>
    %cst_5 = arith.constant 0.000000e+00 : f32
    %7 = vector.broadcast %cst_5 : f32 to vector<8x256xf32>
    %8 = arith.maximumf %6, %7 : vector<8x256xf32>
    %9 = arith.truncf %8 : vector<8x256xf32> to vector<8x256xbf16>
    %c0_6 = arith.constant 0 : index
    %c0_7 = arith.constant 0 : index
    %10 = vector.load %arg4[%c0_6, %c0_7] : memref<256x256xbf16, #tpu.memory_space<vmem>>, vector<256x256xbf16>
    %cst_8 = arith.constant dense<0.000000e+00> : vector<8x256xf32>
    %11 = tpu.matmul %9, %10, %cst_8 {dimension_numbers = #tpu.dot_dimension_numbers<[1], [0], [0], [1], [0, 0, 1, 1], [], []>} : vector<8x256xbf16>, vector<256x256xbf16>, vector<8x256xf32> -> vector<8x256xf32>
    %c0_9 = arith.constant 0 : index
    %c0_10 = arith.constant 0 : index
    %12 = vector.load %arg5[%c0_9, %c0_10] : memref<1x256xf32, #tpu.memory_space<vmem>>, vector<1x256xf32>
    %13 = vector.broadcast %12 : vector<1x256xf32> to vector<8x256xf32>
    %14 = arith.addf %11, %13 : vector<8x256xf32>
    %cst_11 = arith.constant 0.000000e+00 : f32
    %15 = vector.broadcast %cst_11 : f32 to vector<8x256xf32>
    %16 = arith.maximumf %14, %15 : vector<8x256xf32>
    %17 = arith.truncf %16 : vector<8x256xf32> to vector<8x256xbf16>
    %c0_12 = arith.constant 0 : index
    %c0_13 = arith.constant 0 : index
    %18 = vector.load %arg6[%c0_12, %c0_13] : memref<256x256xbf16, #tpu.memory_space<vmem>>, vector<256x256xbf16>
    %cst_14 = arith.constant dense<0.000000e+00> : vector<8x256xf32>
    %19 = tpu.matmul %17, %18, %cst_14 {dimension_numbers = #tpu.dot_dimension_numbers<[1], [0], [0], [1], [0, 0, 1, 1], [], []>} : vector<8x256xbf16>, vector<256x256xbf16>, vector<8x256xf32> -> vector<8x256xf32>
    %c0_15 = arith.constant 0 : index
    %c0_16 = arith.constant 0 : index
    %20 = vector.load %arg7[%c0_15, %c0_16] : memref<1x256xf32, #tpu.memory_space<vmem>>, vector<1x256xf32>
    %21 = vector.broadcast %20 : vector<1x256xf32> to vector<8x256xf32>
    %22 = arith.addf %19, %21 : vector<8x256xf32>
    %cst_17 = arith.constant 0.000000e+00 : f32
    %23 = vector.broadcast %cst_17 : f32 to vector<8x256xf32>
    %24 = arith.maximumf %22, %23 : vector<8x256xf32>
    %25 = arith.truncf %24 : vector<8x256xf32> to vector<8x256xbf16>
    %c0_18 = arith.constant 0 : index
    %c0_19 = arith.constant 0 : index
    %26 = vector.load %arg8[%c0_18, %c0_19] : memref<256x256xbf16, #tpu.memory_space<vmem>>, vector<256x256xbf16>
    %cst_20 = arith.constant dense<0.000000e+00> : vector<8x256xf32>
    %27 = tpu.matmul %25, %26, %cst_20 {dimension_numbers = #tpu.dot_dimension_numbers<[1], [0], [0], [1], [0, 0, 1, 1], [], []>} : vector<8x256xbf16>, vector<256x256xbf16>, vector<8x256xf32> -> vector<8x256xf32>
    %c0_21 = arith.constant 0 : index
    %c0_22 = arith.constant 0 : index
    %28 = vector.load %arg9[%c0_21, %c0_22] : memref<1x256xf32, #tpu.memory_space<vmem>>, vector<1x256xf32>
    %29 = vector.broadcast %28 : vector<1x256xf32> to vector<8x256xf32>
    %30 = arith.addf %27, %29 : vector<8x256xf32>
    %cst_23 = arith.constant 0.000000e+00 : f32
    %31 = vector.broadcast %cst_23 : f32 to vector<8x256xf32>
    %32 = arith.maximumf %30, %31 : vector<8x256xf32>
    %33 = arith.truncf %32 : vector<8x256xf32> to vector<8x256xbf16>
    %c0_24 = arith.constant 0 : index
    %c0_25 = arith.constant 0 : index
    %34 = vector.load %arg10[%c0_24, %c0_25] : memref<256x128xbf16, #tpu.memory_space<vmem>>, vector<256x128xbf16>
    %cst_26 = arith.constant dense<0.000000e+00> : vector<8x128xf32>
    %35 = tpu.matmul %33, %34, %cst_26 {dimension_numbers = #tpu.dot_dimension_numbers<[1], [0], [0], [1], [0, 0, 1, 1], [], []>} : vector<8x256xbf16>, vector<256x128xbf16>, vector<8x128xf32> -> vector<8x128xf32>
    %c0_27 = arith.constant 0 : index
    %c0_28 = arith.constant 0 : index
    %36 = vector.load %arg11[%c0_27, %c0_28] : memref<1x128xf32, #tpu.memory_space<vmem>>, vector<1x128xf32>
    %37 = vector.broadcast %36 : vector<1x128xf32> to vector<8x128xf32>
    %38 = arith.addf %35, %37 : vector<8x128xf32>
    %c0_29 = arith.constant 0 : index
    %c0_30 = arith.constant 0 : index
    %39 = vector.load %arg12[%c0_29, %c0_30] : memref<8x128xf32, #tpu.memory_space<vmem>>, vector<8x128xf32>
    tpu.vector_store %arg12[%c0_29, %c0_30], %38 {strides = array<i32>} : memref<8x128xf32, #tpu.memory_space<vmem>>, vector<8x128xf32>,
    return
  }
  func.func @transform_0(%arg0: i32) -> (i32, i32) {
    %c0_i32 = arith.constant 0 : i32
    %c0_i32_0 = arith.constant 0 : i32
    return %arg0, %c0_i32 : i32, i32
  }
  func.func @transform_1(%arg0: i32) -> (i32, i32) {
    %c0_i32 = arith.constant 0 : i32
    %c0_i32_0 = arith.constant 0 : i32
    %c0_i32_1 = arith.constant 0 : i32
    return %c0_i32, %c0_i32_0 : i32, i32
  }
  func.func @transform_2(%arg0: i32) -> (i32, i32) {
    %c0_i32 = arith.constant 0 : i32
    %c0_i32_0 = arith.constant 0 : i32
    %c0_i32_1 = arith.constant 0 : i32
    return %c0_i32, %c0_i32_0 : i32, i32
  }
  func.func @transform_3(%arg0: i32) -> (i32, i32) {
    %c0_i32 = arith.constant 0 : i32
    %c0_i32_0 = arith.constant 0 : i32
    %c0_i32_1 = arith.constant 0 : i32
    return %c0_i32, %c0_i32_0 : i32, i32
  }
  func.func @transform_4(%arg0: i32) -> (i32, i32) {
    %c0_i32 = arith.constant 0 : i32
    %c0_i32_0 = arith.constant 0 : i32
    %c0_i32_1 = arith.constant 0 : i32
    return %c0_i32, %c0_i32_0 : i32, i32
  }
  func.func @transform_5(%arg0: i32) -> (i32, i32) {
    %c0_i32 = arith.constant 0 : i32
    %c0_i32_0 = arith.constant 0 : i32
    %c0_i32_1 = arith.constant 0 : i32
    return %c0_i32, %c0_i32_0 : i32, i32
  }
  func.func @transform_6(%arg0: i32) -> (i32, i32) {
    %c0_i32 = arith.constant 0 : i32
    %c0_i32_0 = arith.constant 0 : i32
    %c0_i32_1 = arith.constant 0 : i32
    return %c0_i32, %c0_i32_0 : i32, i32
  }
  func.func @transform_7(%arg0: i32) -> (i32, i32) {
    %c0_i32 = arith.constant 0 : i32
    %c0_i32_0 = arith.constant 0 : i32
    %c0_i32_1 = arith.constant 0 : i32
    return %c0_i32, %c0_i32_0 : i32, i32
  }
  func.func @transform_8(%arg0: i32) -> (i32, i32) {
    %c0_i32 = arith.constant 0 : i32
    %c0_i32_0 = arith.constant 0 : i32
    %c0_i32_1 = arith.constant 0 : i32
    return %c0_i32, %c0_i32_0 : i32, i32
  }
  func.func @transform_9(%arg0: i32) -> (i32, i32) {
    %c0_i32 = arith.constant 0 : i32
    %c0_i32_0 = arith.constant 0 : i32
    %c0_i32_1 = arith.constant 0 : i32
    return %c0_i32, %c0_i32_0 : i32, i32
  }
  func.func @transform_10(%arg0: i32) -> (i32, i32) {
    %c0_i32 = arith.constant 0 : i32
    %c0_i32_0 = arith.constant 0 : i32
    %c0_i32_1 = arith.constant 0 : i32
    return %c0_i32, %c0_i32_0 : i32, i32
  }
  func.func @transform_11(%arg0: i32) -> (i32, i32) {
    %c0_i32 = arith.constant 0 : i32
    %c0_i32_0 = arith.constant 0 : i32
    return %arg0, %c0_i32 : i32, i32
  }
}

module attributes {stable_mosaic.version = 11 : i64} {
  func.func @mlp_kernel(%arg0: i32, %arg1: memref<8x1024xf32, #tpu.memory_space<vmem>>, %arg2: memref<1024x256xbf16, #tpu.memory_space<vmem>>, %arg3: memref<1x256xf32, #tpu.memory_space<vmem>>, %arg4: memref<256x256xbf16, #tpu.memory_space<vmem>>, %arg5: memref<1x256xf32, #tpu.memory_space<vmem>>, %arg6: memref<256x256xbf16, #tpu.memory_space<vmem>>, %arg7: memref<1x256xf32, #tpu.memory_space<vmem>>, %arg8: memref<256x256xbf16, #tpu.memory_space<vmem>>, %arg9: memref<1x256xf32, #tpu.memory_space<vmem>>, %arg10: memref<256x128xbf16, #tpu.memory_space<vmem>>, %arg11: memref<1x128xf32, #tpu.memory_space<vmem>>, %arg12: memref<8x128xf32, #tpu.memory_space<vmem>>) attributes {dimension_semantics = [#tpu.dimension_semantics<parallel>], iteration_bounds = array<i64: 1>, scalar_prefetch = 0 : i64, scratch_operands = 0 : i64, tpu.core_type = #tpu.core_type<tc>, window_params = [{transform_indices = @transform_0, window_bounds = array<i64: 8, 1024>}, {pipeline_mode = #tpu.pipeline_mode<synchronous>, transform_indices = @transform_1, window_bounds = array<i64: 1024, 256>}, {pipeline_mode = #tpu.pipeline_mode<synchronous>, transform_indices = @transform_2, window_bounds = array<i64: 1, 256>}, {pipeline_mode = #tpu.pipeline_mode<synchronous>, transform_indices = @transform_3, window_bounds = array<i64: 256, 256>}, {pipeline_mode = #tpu.pipeline_mode<synchronous>, transform_indices = @transform_4, window_bounds = array<i64: 1, 256>}, {pipeline_mode = #tpu.pipeline_mode<synchronous>, transform_indices = @transform_5, window_bounds = array<i64: 256, 256>}, {pipeline_mode = #tpu.pipeline_mode<synchronous>, transform_indices = @transform_6, window_bounds = array<i64: 1, 256>}, {pipeline_mode = #tpu.pipeline_mode<synchronous>, transform_indices = @transform_7, window_bounds = array<i64: 256, 256>}, {pipeline_mode = #tpu.pipeline_mode<synchronous>, transform_indices = @transform_8, window_bounds = array<i64: 1, 256>}, {pipeline_mode = #tpu.pipeline_mode<synchronous>, transform_indices = @transform_9, window_bounds = array<i64: 256, 128>}, {pipeline_mode = #tpu.pipeline_mode<synchronous>, transform_indices = @transform_10, window_bounds = array<i64: 1, 128>}, {transform_indices = @transform_11, window_bounds = array<i64: 8, 128>}]} {
    %c0 = arith.constant 0 : index
    %c0_0 = arith.constant 0 : index
    %0 = vector.load %arg1[%c0, %c0_0] : memref<8x1024xf32, #tpu.memory_space<vmem>>, vector<8x1024xf32>
    %1 = arith.truncf %0 : vector<8x1024xf32> to vector<8x1024xbf16>
    %c0_1 = arith.constant 0 : index
    %c0_2 = arith.constant 0 : index
    %2 = vector.load %arg2[%c0_1, %c0_2] : memref<1024x256xbf16, #tpu.memory_space<vmem>>, vector<1024x256xbf16>
    %cst = arith.constant dense<0.000000e+00> : vector<8x256xf32>
    %3 = tpu.matmul %1, %2, %cst {dimension_numbers = #tpu.dot_dimension_numbers<[1], [0], [0], [1], [0, 0, 1, 1], [], []>} : vector<8x1024xbf16>, vector<1024x256xbf16>, vector<8x256xf32> -> vector<8x256xf32>
    %c0_3 = arith.constant 0 : index
    %c0_4 = arith.constant 0 : index
    %4 = vector.load %arg3[%c0_3, %c0_4] : memref<1x256xf32, #tpu.memory_space<vmem>>, vector<1x256xf32>
    %5 = vector.broadcast %4 : vector<1x256xf32> to vector<8x256xf32>
    %6 = arith.addf %3, %5 : vector<8x256xf32>
    %cst_5 = arith.constant 0.000000e+00 : f32
    %7 = vector.broadcast %cst_5 : f32 to vector<8x256xf32>
    %8 = arith.maximumf %6, %7 : vector<8x256xf32>
    %9 = arith.truncf %8 : vector<8x256xf32> to vector<8x256xbf16>
    %c0_6 = arith.constant 0 : index
    %c0_7 = arith.constant 0 : index
    %10 = vector.load %arg4[%c0_6, %c0_7] : memref<256x256xbf16, #tpu.memory_space<vmem>>, vector<256x256xbf16>
    %cst_8 = arith.constant dense<0.000000e+00> : vector<8x256xf32>
    %11 = tpu.matmul %9, %10, %cst_8 {dimension_numbers = #tpu.dot_dimension_numbers<[1], [0], [0], [1], [0, 0, 1, 1], [], []>} : vector<8x256xbf16>, vector<256x256xbf16>, vector<8x256xf32> -> vector<8x256xf32>
    %c0_9 = arith.constant 0 : index
    %c0_10 = arith.constant 0 : index
    %12 = vector.load %arg5[%c0_9, %c0_10] : memref<1x256xf32, #tpu.memory_space<vmem>>, vector<1x256xf32>
    %13 = vector.broadcast %12 : vector<1x256xf32> to vector<8x256xf32>
    %14 = arith.addf %11, %13 : vector<8x256xf32>
    %cst_11 = arith.constant 0.000000e+00 : f32
    %15 = vector.broadcast %cst_11 : f32 to vector<8x256xf32>
    %16 = arith.maximumf %14, %15 : vector<8x256xf32>
    %17 = arith.truncf %16 : vector<8x256xf32> to vector<8x256xbf16>
    %c0_12 = arith.constant 0 : index
    %c0_13 = arith.constant 0 : index
    %18 = vector.load %arg6[%c0_12, %c0_13] : memref<256x256xbf16, #tpu.memory_space<vmem>>, vector<256x256xbf16>
    %cst_14 = arith.constant dense<0.000000e+00> : vector<8x256xf32>
    %19 = tpu.matmul %17, %18, %cst_14 {dimension_numbers = #tpu.dot_dimension_numbers<[1], [0], [0], [1], [0, 0, 1, 1], [], []>} : vector<8x256xbf16>, vector<256x256xbf16>, vector<8x256xf32> -> vector<8x256xf32>
    %c0_15 = arith.constant 0 : index
    %c0_16 = arith.constant 0 : index
    %20 = vector.load %arg7[%c0_15, %c0_16] : memref<1x256xf32, #tpu.memory_space<vmem>>, vector<1x256xf32>
    %21 = vector.broadcast %20 : vector<1x256xf32> to vector<8x256xf32>
    %22 = arith.addf %19, %21 : vector<8x256xf32>
    %cst_17 = arith.constant 0.000000e+00 : f32
    %23 = vector.broadcast %cst_17 : f32 to vector<8x256xf32>
    %24 = arith.maximumf %22, %23 : vector<8x256xf32>
    %25 = arith.truncf %24 : vector<8x256xf32> to vector<8x256xbf16>
    %c0_18 = arith.constant 0 : index
    %c0_19 = arith.constant 0 : index
    %26 = vector.load %arg8[%c0_18, %c0_19] : memref<256x256xbf16, #tpu.memory_space<vmem>>, vector<256x256xbf16>
    %cst_20 = arith.constant dense<0.000000e+00> : vector<8x256xf32>
    %27 = tpu.matmul %25, %26, %cst_20 {dimension_numbers = #tpu.dot_dimension_numbers<[1], [0], [0], [1], [0, 0, 1, 1], [], []>} : vector<8x256xbf16>, vector<256x256xbf16>, vector<8x256xf32> -> vector<8x256xf32>
    %c0_21 = arith.constant 0 : index
    %c0_22 = arith.constant 0 : index
    %28 = vector.load %arg9[%c0_21, %c0_22] : memref<1x256xf32, #tpu.memory_space<vmem>>, vector<1x256xf32>
    %29 = vector.broadcast %28 : vector<1x256xf32> to vector<8x256xf32>
    %30 = arith.addf %27, %29 : vector<8x256xf32>
    %cst_23 = arith.constant 0.000000e+00 : f32
    %31 = vector.broadcast %cst_23 : f32 to vector<8x256xf32>
    %32 = arith.maximumf %30, %31 : vector<8x256xf32>
    %33 = arith.truncf %32 : vector<8x256xf32> to vector<8x256xbf16>
    %c0_24 = arith.constant 0 : index
    %c0_25 = arith.constant 0 : index
    %34 = vector.load %arg10[%c0_24, %c0_25] : memref<256x128xbf16, #tpu.memory_space<vmem>>, vector<256x128xbf16>
    %cst_26 = arith.constant dense<0.000000e+00> : vector<8x128xf32>
    %35 = tpu.matmul %33, %34, %cst_26 {dimension_numbers = #tpu.dot_dimension_numbers<[1], [0], [0], [1], [0, 0, 1, 1], [], []>} : vector<8x256xbf16>, vector<256x128xbf16>, vector<8x128xf32> -> vector<8x128xf32>
    %c0_27 = arith.constant 0 : index
    %c0_28 = arith.constant 0 : index
    %36 = vector.load %arg11[%c0_27, %c0_28] : memref<1x128xf32, #tpu.memory_space<vmem>>, vector<1x128xf32>
    %37 = vector.broadcast %36 : vector<1x128xf32> to vector<8x128xf32>
    %38 = arith.addf %35, %37 : vector<8x128xf32>
    %c0_29 = arith.constant 0 : index
    %c0_30 = arith.constant 0 : index
    %39 = vector.load %arg12[%c0_29, %c0_30] : memref<8x128xf32, #tpu.memory_space<vmem>>, vector<8x128xf32>
    tpu.vector_store %arg12[%c0_29, %c0_30], %38 {strides = array<i32>} : memref<8x128xf32, #tpu.memory_space<vmem>>, vector<8x128xf32>,
    return
  }
  func.func @transform_0(%arg0: i32) -> (i32, i32) {
    %c0_i32 = arith.constant 0 : i32
    %c0_i32_0 = arith.constant 0 : i32
    return %arg0, %c0_i32 : i32, i32
  }
  func.func @transform_1(%arg0: i32) -> (i32, i32) {
    %c0_i32 = arith.constant 0 : i32
    %c0_i32_0 = arith.constant 0 : i32
    %c0_i32_1 = arith.constant 0 : i32
    return %c0_i32, %c0_i32_0 : i32, i32
  }
  func.func @transform_2(%arg0: i32) -> (i32, i32) {
    %c0_i32 = arith.constant 0 : i32
    %c0_i32_0 = arith.constant 0 : i32
    %c0_i32_1 = arith.constant 0 : i32
    return %c0_i32, %c0_i32_0 : i32, i32
  }
  func.func @transform_3(%arg0: i32) -> (i32, i32) {
    %c0_i32 = arith.constant 0 : i32
    %c0_i32_0 = arith.constant 0 : i32
    %c0_i32_1 = arith.constant 0 : i32
    return %c0_i32, %c0_i32_0 : i32, i32
  }
  func.func @transform_4(%arg0: i32) -> (i32, i32) {
    %c0_i32 = arith.constant 0 : i32
    %c0_i32_0 = arith.constant 0 : i32
    %c0_i32_1 = arith.constant 0 : i32
    return %c0_i32, %c0_i32_0 : i32, i32
  }
  func.func @transform_5(%arg0: i32) -> (i32, i32) {
    %c0_i32 = arith.constant 0 : i32
    %c0_i32_0 = arith.constant 0 : i32
    %c0_i32_1 = arith.constant 0 : i32
    return %c0_i32, %c0_i32_0 : i32, i32
  }
  func.func @transform_6(%arg0: i32) -> (i32, i32) {
    %c0_i32 = arith.constant 0 : i32
    %c0_i32_0 = arith.constant 0 : i32
    %c0_i32_1 = arith.constant 0 : i32
    return %c0_i32, %c0_i32_0 : i32, i32
  }
  func.func @transform_7(%arg0: i32) -> (i32, i32) {
    %c0_i32 = arith.constant 0 : i32
    %c0_i32_0 = arith.constant 0 : i32
    %c0_i32_1 = arith.constant 0 : i32
    return %c0_i32, %c0_i32_0 : i32, i32
  }
  func.func @transform_8(%arg0: i32) -> (i32, i32) {
    %c0_i32 = arith.constant 0 : i32
    %c0_i32_0 = arith.constant 0 : i32
    %c0_i32_1 = arith.constant 0 : i32
    return %c0_i32, %c0_i32_0 : i32, i32
  }
  func.func @transform_9(%arg0: i32) -> (i32, i32) {
    %c0_i32 = arith.constant 0 : i32
    %c0_i32_0 = arith.constant 0 : i32
    %c0_i32_1 = arith.constant 0 : i32
    return %c0_i32, %c0_i32_0 : i32, i32
  }
  func.func @transform_10(%arg0: i32) -> (i32, i32) {
    %c0_i32 = arith.constant 0 : i32
    %c0_i32_0 = arith.constant 0 : i32
    %c0_i32_1 = arith.constant 0 : i32
    return %c0_i32, %c0_i32_0 : i32, i32
  }
  func.func @transform_11(%arg0: i32) -> (i32, i32) {
    %c0_i32 = arith.constant 0 : i32
    %c0_i32_0 = arith.constant 0 : i32
    return %arg0, %c0_i32 : i32, i32
  }
}

</mosaic_0001>

<bundles_post_ra>
// kernel: tpu_custom_call.1
= control target key start
LH: loop header
LB: loop body
LE: loop exit
PB: predicated region body
PF: predicated region fallthrough
CT: control target
= control target key end

     0   :  { %16 = vsyncpa [#allocation3], 0  ;;  %s3077_s0 = inlined_call_operand.hbm [shape: f32[2,1024], index: 0, kind: input, shape index: {}]   ;;  %s3078_s1 = inlined_call_operand.hbm [shape: bf16[1024,256], index: 1, kind: input, shape index: {}]   ;;  %s3079_s2 = inlined_call_operand.vmem [shape: f32[1,256], index: 2, kind: input, shape index: {}]   ;;  %s3080_s3 = inlined_call_operand.hbm [shape: bf16[256,256], index: 3, kind: input, shape index: {}]   ;;  %s3081_s4 = inlined_call_operand.vmem [shape: f32[1,256], index: 4, kind: input, shape index: {}]   ;;  %s3082_s5 = inlined_call_operand.hbm [shape: bf16[256,256], index: 5, kind: input, shape index: {}]   ;;  %s3083_s6 = inlined_call_operand.vmem [shape: f32[1,256], index: 6, kind: input, shape index: {}]   ;;  %s3084_s7 = inlined_call_operand.hbm [shape: bf16[256,256], index: 7, kind: input, shape index: {}]   ;;  %s3085_s8 = inlined_call_operand.vmem [shape: f32[1,256], index: 8, kind: input, shape index: {}]   ;;  %s3086_s9 = inlined_call_operand.hbm [shape: bf16[256,128], index: 9, kind: input, shape index: {}]   ;;  %s3087_s10 = inlined_call_operand.vmem [shape: f32[1,128], index: 10, kind: input, shape index: {}]   ;;  %s3088_s11 = inlined_call_operand.hbm [shape: f32[2,128], index: 11, kind: output, shape index: {}]  }
   0x1   :  { %17 = vsyncpa [#allocation6], 0 }
   0x2   :  { %18 = vsyncpa [#allocation9], 0 }
   0x3   :  { %19 = vsyncpa [#allocation12], 0 }
   0x4   :  { %20 = vsyncpa [#allocation4], 0 }
   0x5   :  { %25 = vsyncadd [#allocation3], 768  ;;  %s2910_s17 = smov [#allocation5]  }
   0x6   :  { %s38_s18 = sshll.u32 %s2910_s17, 4  ;;  %s39_s18 = int_to_ptr.vmem [resolvable:$true] %s38_s18 }
   0x7   :  { %s2768_s19 = scalar_lea.vmem %s39_s18, 16384  ;;  %p2773_p1 = scmp.lt.s32.totalorder %s39_s18, %s39_s18 }
   0x8   :  { %p2769_p0 = scmp.ne.s32.totalorder %s39_s18, %s2768_s19  ;;  %p2774_p2 = scmp.lt.s32.totalorder %s2768_s19, %s2768_s19 }
   0xa   :  { %p2775_p3 = por %p2774_p2, %p2773_p1 }
   0xc   :  { %p2776_p4 = pnand %p2775_p3, %p2769_p0 }
   0xe   :  { %2779 = shalt.err (!%p2776_p4)
}
   0xf   :  { %s2911_s20 = smov 128   ;;  %s2912_s21 = smov 8  }
  0x10   :  { %44 = dma.hbm_to_vmem [thread:$0]  %s3078_s1, 16384, %s39_s18, [#allocation6], %s2911_s20, %s2911_s20, %s2912_s21  }
  0x11   :  { %s2913_s24 = smov [#allocation8]   ;;  %s2914_s26 = smov [#allocation2]  }
  0x12   :  { %s66_s25 = sshll.u32 %s2913_s24, 4  ;;  %s26_s27 = sshll.u32 %s2914_s26, 4  ;;  %s67_s25 = int_to_ptr.vmem [resolvable:$true] %s66_s25  ;;  %s27_s27 = int_to_ptr.vmem [resolvable:$true] %s26_s27 }
  0x13   :  { %s2788_s28 = scalar_lea.vmem %s67_s25, 4096  ;;  %p2793_p6 = scmp.lt.s32.totalorder %s67_s25, %s67_s25 }
  0x14   :  { %p2789_p5 = scmp.ne.s32.totalorder %s67_s25, %s2788_s28  ;;  %p2794_p7 = scmp.lt.s32.totalorder %s2788_s28, %s2788_s28 }
  0x16   :  { %p2795_p8 = por %p2794_p7, %p2793_p6 }
  0x18   :  { %p2796_p9 = pnand %p2795_p8, %p2789_p5 }
  0x1a   :  { %2799 = shalt.err (!%p2796_p9)
}
  0x1b   :  { %72 = dma.hbm_to_vmem [thread:$0]  %s3082_s5, 4096, %s67_s25, [#allocation9], %s2911_s20, %s2911_s20, %s2912_s21  }
  0x1c   :  { %s2808_s1 = scalar_lea.vmem %s27_s27, 256  ;;  %s2812_s12 = scalar_lea.vmem %s27_s27, 1024 }
  0x1d   :  { %p2809_p10 = scmp.ne.s32.totalorder %s27_s27, %s2808_s1  ;;  %p2813_p11 = scmp.lt.s32.totalorder %s27_s27, %s27_s27 }
  0x1e   :  { %p2814_p12 = scmp.lt.s32.totalorder %s2812_s12, %s2808_s1 }
  0x20   :  { %p2815_p13 = por %p2814_p12, %p2813_p11 }
  0x22   :  { %p2816_p0 = pnand %p2815_p13, %p2809_p10 }
  0x24   :  { %2819 = shalt.err (!%p2816_p0)
}
  0x25   :  { %s2915_s13 = smov 256   ;;  %s2916_s14 = smov 16  }
  0x26   :  { %32 = dma.hbm_to_vmem [thread:$0]  %s3077_s0, 256, %s27_s27, [#allocation3], %s2915_s13, %s2915_s13, %s2916_s14  }
  0x27   :  { %s2917_s17 = smov [#allocation7]   ;;  %s2918_s19 = smov [#allocation10]  }
  0x28   :  { %s52_s18 = sshll.u32 %s2917_s17, 4  ;;  %s80_s5 = sshll.u32 %s2918_s19, 4  ;;  %s53_s18 = int_to_ptr.vmem [resolvable:$true] %s52_s18  ;;  %s81_s5 = int_to_ptr.vmem [resolvable:$true] %s80_s5 }
  0x29   :  { %s2828_s22 = scalar_lea.vmem %s53_s18, 4096  ;;  %p2833_p2 = scmp.lt.s32.totalorder %s53_s18, %s53_s18 }
  0x2a   :  { %p2829_p1 = scmp.ne.s32.totalorder %s53_s18, %s2828_s22  ;;  %p2834_p3 = scmp.lt.s32.totalorder %s2828_s22, %s2828_s22 }
  0x2c   :  { %p2835_p4 = por %p2834_p3, %p2833_p2 }
  0x2e   :  { %p2836_p5 = pnand %p2835_p4, %p2829_p1 }
  0x30   :  { %2839 = shalt.err (!%p2836_p5)
}
  0x31   :  { %58 = dma.hbm_to_vmem [thread:$0]  %s3080_s3, 4096, %s53_s18, [#allocation6], %s2911_s20, %s2911_s20, %s2912_s21  }
  0x32   :  { %s2848_s0 = scalar_lea.vmem %s81_s5, 4096  ;;  %p2853_p7 = scmp.lt.s32.totalorder %s81_s5, %s81_s5 }
  0x33   :  { %p2849_p6 = scmp.ne.s32.totalorder %s81_s5, %s2848_s0  ;;  %p2854_p8 = scmp.lt.s32.totalorder %s2848_s0, %s2848_s0 }
  0x35   :  { %p2855_p9 = por %p2854_p8, %p2853_p7 }
  0x37   :  { %p2856_p10 = pnand %p2855_p9, %p2849_p6 }
  0x39   :  { %2859 = shalt.err (!%p2856_p10)
}
  0x3a   :  { %86 = dma.hbm_to_vmem [thread:$0]  %s3084_s7, 4096, %s81_s5, [#allocation9], %s2911_s20, %s2911_s20, %s2912_s21  }
  0x3b   :  { %s2919_s27 = smov [#allocation11]  }
  0x3c   :  { %s94_s28 = sshll.u32 %s2919_s27, 4  ;;  %s95_s28 = int_to_ptr.vmem [resolvable:$true] %s94_s28 }
  0x3d   :  { %s2868_s29 = scalar_lea.vmem %s95_s28, 2048  ;;  %p2873_p12 = scmp.lt.s32.totalorder %s95_s28, %s95_s28 }
  0x3e   :  { %p2869_p11 = scmp.ne.s32.totalorder %s95_s28, %s2868_s29  ;;  %p2874_p13 = scmp.lt.s32.totalorder %s2868_s29, %s2868_s29 }
  0x40   :  { %p2875_p0 = por %p2874_p13, %p2873_p12 }
  0x42   :  { %p2876_p1 = pnand %p2875_p0, %p2869_p11 }
  0x44   :  { %2879 = shalt.err (!%p2876_p1)
}
  0x45   :  { %s2920_s3 = smov 64   ;;  %s2921_s30 = smov 4  }
  0x46   :  { %100 = dma.hbm_to_vmem [thread:$0]  %s3086_s9, 2048, %s95_s28, [#allocation12], %s2920_s3, %s2920_s3, %s2921_s30  }
  0x47   :  { %2900 = dma.done.wait [#allocation3], 1024  }
  0x48   :  { %2901 = vsyncadd [#allocation3], 4294966272 }
  0x49   :  { %2902 = dma.done.wait [#allocation6], 20480  }
  0x4a   :  { %2903 = vsyncadd [#allocation6], 4294946816 }
  0x4b   :  { %2904 = dma.done.wait [#allocation9], 8192  }
  0x4c   :  { %2905 = vsyncadd [#allocation9], 4294959104 }
  0x4d   :  { %2906 = dma.done.wait [#allocation12], 2048  }
  0x4e   :  { %2907 = vsyncadd [#allocation12], 4294965248  ;;  %v2396_v0 = vld [vmem:[#allocation5 + $0x74] ss:$8 sps:$4 sm:$0xff]   ;;  %v2400_v2 = vld [vmem:[#allocation5 + $0x70] ss:$8 sps:$4 sm:$0xff]   ;;  %v145_v40 = vlaneseq }
  0x4f   :  { %v2398_v1 = vld [vmem:[#allocation5 + $0x174] ss:$8 sps:$4 sm:$0xff]   ;;  %1006 = vmatprep.subr.bf16.mxu0 %v2396_v0  ;;  %v2401_v3 = vld [vmem:[#allocation5 + $0x170] ss:$8 sps:$4 sm:$0xff]   ;;  %v2402_v4 = vld [vmem:[#allocation5 + $0x64] ss:$8 sps:$4 sm:$0xff]  }
  0x50   :  { %1047 = vmatprep.subr.bf16.mxu1 %v2398_v1  ;;  %1007 = vmatpush1.bf16.msra.mxu0 %v2400_v2  ;;  %v2404_v5 = vld [vmem:[#allocation5 + $0x164] ss:$8 sps:$4 sm:$0xff]   ;;  %v2406_v6 = vld [vmem:[#allocation5 + $0x60] ss:$8 sps:$4 sm:$0xff]   ;;  %v2408_v8 = vld [vmem:[#allocation5 + $0x54] ss:$8 sps:$4 sm:$0xff]  }
  0x51   :  { %1048 = vmatpush1.bf16.msra.mxu1 %v2401_v3  ;;  %1008 = vmatprep.subr.bf16.mxu0 %v2402_v4  ;;  %v2407_v7 = vld [vmem:[#allocation5 + $0x160] ss:$8 sps:$4 sm:$0xff]   ;;  %v2410_v9 = vld [vmem:[#allocation5 + $0x154] ss:$8 sps:$4 sm:$0xff]   ;;  %v2412_v10 = vld [vmem:[#allocation5 + $0x50] ss:$8 sps:$4 sm:$0xff]  }
  0x52   :  { %1049 = vmatprep.subr.bf16.mxu1 %v2404_v5  ;;  %v2413_v11 = vld [vmem:[#allocation5 + $0x150] ss:$8 sps:$4 sm:$0xff]   ;;  %v2414_v12 = vld [vmem:[#allocation5 + $0x44] ss:$8 sps:$4 sm:$0xff]   ;;  %v2418_v14 = vld [vmem:[#allocation5 + $0x40] ss:$8 sps:$4 sm:$0xff]  }
  0x53   :  { %v2416_v13 = vld [vmem:[#allocation5 + $0x144] ss:$8 sps:$4 sm:$0xff]   ;;  %v2419_v15 = vld [vmem:[#allocation5 + $0x140] ss:$8 sps:$4 sm:$0xff]   ;;  %v2420_v16 = vld [vmem:[#allocation5 + $0x34] ss:$8 sps:$4 sm:$0xff]  }
  0x54   :  { %1009 = vmatpush1.bf16.msra.mxu0 %v2406_v6  ;;  %v2422_v17 = vld [vmem:[#allocation5 + $0x134] ss:$8 sps:$4 sm:$0xff]   ;;  %v2424_v18 = vld [vmem:[#allocation5 + $0x30] ss:$8 sps:$4 sm:$0xff]   ;;  %v2426_v20 = vld [vmem:[#allocation5 + $0x24] ss:$8 sps:$4 sm:$0xff]  }
  0x55   :  { %1050 = vmatpush1.bf16.msra.mxu1 %v2407_v7  ;;  %1010 = vmatprep.subr.bf16.mxu0 %v2408_v8  ;;  %v2425_v19 = vld [vmem:[#allocation5 + $0x130] ss:$8 sps:$4 sm:$0xff]   ;;  %v2428_v21 = vld [vmem:[#allocation5 + $0x124] ss:$8 sps:$4 sm:$0xff]   ;;  %v2430_v22 = vld [vmem:[#allocation5 + $0x20] ss:$8 sps:$4 sm:$0xff]  }
  0x56   :  { %1051 = vmatprep.subr.bf16.mxu1 %v2410_v9  ;;  %v2431_v23 = vld [vmem:[#allocation5 + $0x120] ss:$8 sps:$4 sm:$0xff]   ;;  %v2432_v24 = vld [vmem:[#allocation5 + $0x14] ss:$8 sps:$4 sm:$0xff]   ;;  %v2436_v26 = vld [vmem:[#allocation5 + $0x10] ss:$8 sps:$4 sm:$0xff]  }
  0x57   :  { %v2434_v25 = vld [vmem:[#allocation5 + $0x114] ss:$8 sps:$4 sm:$0xff]   ;;  %v2437_v27 = vld [vmem:[#allocation5 + $0x110] ss:$8 sps:$4 sm:$0xff]   ;;  %v2438_v28 = vld [vmem:[#allocation5 + $0x4] ss:$8 sps:$4 sm:$0xff]  }
  0x58   :  { %1011 = vmatpush1.bf16.msra.mxu0 %v2412_v10  ;;  %v2440_v29 = vld [vmem:[#allocation5 + $0x104] ss:$8 sps:$4 sm:$0xff]   ;;  %v2442_v30 = vld [vmem:[#allocation5] ss:$8 sps:$4 sm:$0xff]   ;;  %v2444_v32 = vld [vmem:[#allocation5 + $0xf4] ss:$8 sps:$4 sm:$0xff]  }
  0x59   :  { %1052 = vmatpush1.bf16.msra.mxu1 %v2413_v11  ;;  %1012 = vmatprep.subr.bf16.mxu0 %v2414_v12  ;;  %v2443_v31 = vld [vmem:[#allocation5 + $0x100] ss:$8 sps:$4 sm:$0xff]   ;;  %v2446_v33 = vld [vmem:[#allocation5 + $0x1f4] ss:$8 sps:$4 sm:$0xff]   ;;  %v2448_v34 = vld [vmem:[#allocation5 + $0xf0] ss:$8 sps:$4 sm:$0xff]  }
  0x5a   :  { %1053 = vmatprep.subr.bf16.mxu1 %v2416_v13  ;;  %v2449_v35 = vld [vmem:[#allocation5 + $0x1f0] ss:$8 sps:$4 sm:$0xff]   ;;  %v2450_v36 = vld [vmem:[#allocation5 + $0xe4] ss:$8 sps:$4 sm:$0xff]   ;;  %v2922_v38 = vmov 1983009808  }
  0x5b   :  { %v2452_v37 = vld [vmem:[#allocation5 + $0x1e4] ss:$8 sps:$4 sm:$0xff]   ;;  %v143_v39 = vunpack.c.l.s4 %v2922_v38  ;;  %v2454_v41 = vld [vmem:[#allocation5 + $0xe0] ss:$8 sps:$4 sm:$0xff]   ;;  %v2456_v43 = vld [vmem:[#allocation5 + $0xd4] ss:$8 sps:$4 sm:$0xff]  }
  0x5c   :  { %1013 = vmatpush1.bf16.msra.mxu0 %v2418_v14  ;;  %v2455_v42 = vld [vmem:[#allocation5 + $0x1e0] ss:$8 sps:$4 sm:$0xff]   ;;  %v2458_v44 = vld [vmem:[#allocation5 + $0x1d4] ss:$8 sps:$4 sm:$0xff]   ;;  %v3016_v46 = vshrl.u32 %v145_v40, 7 }
  0x5d   :  { %1054 = vmatpush1.bf16.msra.mxu1 %v2419_v15  ;;  %1014 = vmatprep.subr.bf16.mxu0 %v2420_v16  ;;  %v144_v45 = vunpack.c.0.s8 %v143_v39  ;;  %v2460_v47 = vld [vmem:[#allocation5 + $0xd0] ss:$8 sps:$4 sm:$0xff]   ;;  %v2462_v49 = vld [vmem:[#allocation5 + $0xc4] ss:$8 sps:$4 sm:$0xff]   ;;  %v2466_v51 = vld [vmem:[#allocation5 + $0xc0] ss:$8 sps:$4 sm:$0xff]  }
  0x5e   :  { %1055 = vmatprep.subr.bf16.mxu1 %v2422_v17  ;;  %v2461_v48 = vld [vmem:[#allocation5 + $0x1d0] ss:$8 sps:$4 sm:$0xff]   ;;  %v2464_v50 = vld [vmem:[#allocation5 + $0x1c4] ss:$8 sps:$4 sm:$0xff]   ;;  %v2467_v52 = vld [vmem:[#allocation5 + $0x1c0] ss:$8 sps:$4 sm:$0xff]  }
  0x5f   :  { %v3019_v53 = vsub.s32 %v144_v45, %v3016_v46  ;;  %v2468_v54 = vld [vmem:[#allocation5 + $0xb4] ss:$8 sps:$4 sm:$0xff]   ;;  %v2492_v56 = vld [vmem:[#allocation2] ss:$16 sps:$4 sm:$0xff]   ;;  %v2474_v2 = vld [vmem:[#allocation5 + $0xa4] ss:$8 sps:$4 sm:$0xff]  }
  0x60   :  { %1015 = vmatpush1.bf16.msra.mxu0 %v2424_v18  ;;  %v2470_v55 = vld [vmem:[#allocation5 + $0x1b4] ss:$8 sps:$4 sm:$0xff]   ;;  %v2494_v57 = vld [vmem:[#allocation2 + $0x20] ss:$16 sps:$4 sm:$0xff]   ;;  %v2476_v4 = vld [vmem:[#allocation5 + $0x1a4] ss:$8 sps:$4 sm:$0xff]  }
  0x61   :  { %1056 = vmatpush1.bf16.msra.mxu1 %v2425_v19  ;;  %1016 = vmatprep.subr.bf16.mxu0 %v2426_v20  ;;  %v2496_v58 = vld [vmem:[#allocation2 + $0x4] ss:$16 sps:$4 sm:$0xff]   ;;  %v148_v60 = vrot.slane %v2492_v56, %v3019_v53  ;;  %v162_v61 = vrot.slane %v2494_v57, %v3019_v53  ;;  %v2472_v63 = vld [vmem:[#allocation5 + $0xb0] ss:$8 sps:$4 sm:$0xff]   ;;  %v2478_v7 = vld [vmem:[#allocation5 + $0xa0] ss:$8 sps:$4 sm:$0xff]  }
  0x62   :  { %1057 = vmatprep.subr.bf16.mxu1 %v2428_v21  ;;  %v2497_v59 = vld [vmem:[#allocation2 + $0x24] ss:$16 sps:$4 sm:$0xff]   ;;  %v155_v62 = vrot.slane %v2496_v58, %v3019_v53  ;;  %v2473_v0 = vld [vmem:[#allocation5 + $0x1b0] ss:$8 sps:$4 sm:$0xff]   ;;  %v2479_v8 = vld [vmem:[#allocation5 + $0x1a0] ss:$8 sps:$4 sm:$0xff]  }
  0x63   :  { %v169_v1 = vrot.slane %v2497_v59, %v3019_v53  ;;  %v171_v3 = vcombine.high %v148_v60, %v162_v61  ;;  %v2480_v10 = vld [vmem:[#allocation5 + $0x94] ss:$8 sps:$4 sm:$0xff]   ;;  %v2484_v12 = vld [vmem:[#allocation5 + $0x90] ss:$8 sps:$4 sm:$0xff]   ;;  %v2486_v14 = vld [vmem:[#allocation5 + $0x84] ss:$8 sps:$4 sm:$0xff]   ;;  %v170_v18 = vcombine.low %v148_v60, %v162_v61 }
  0x64   :  { %1017 = vmatpush1.bf16.msra.mxu0 %v2430_v22  ;;  %v2482_v11 = vld [vmem:[#allocation5 + $0x194] ss:$8 sps:$4 sm:$0xff]   ;;  %v2485_v13 = vld [vmem:[#allocation5 + $0x190] ss:$8 sps:$4 sm:$0xff]   ;;  %v2488_v15 = vld [vmem:[#allocation5 + $0x184] ss:$8 sps:$4 sm:$0xff]  }
  0x65   :  { %1058 = vmatpush1.bf16.msra.mxu1 %v2431_v23  ;;  %1018 = vmatprep.subr.bf16.mxu0 %v2432_v24  ;;  %v173_v5 = vcombine.high %v155_v62, %v169_v1  ;;  %v219_v6 = vpack.c.bf16 %v171_v3, %v171_v3  ;;  %v2490_v16 = vld [vmem:[#allocation5 + $0x80] ss:$8 sps:$4 sm:$0xff]   ;;  %v172_v19 = vcombine.low %v155_v62, %v169_v1  ;;  %v2500_v20 = vld [vmem:[#allocation5 + $0x274] ss:$8 sps:$4 sm:$0xff]   ;;  %v2498_v24 = vld [vmem:[#allocation5 + $0x270] ss:$8 sps:$4 sm:$0xff]  }
  0x66   :  { %1059 = vmatprep.subr.bf16.mxu1 %v2434_v25  ;;  %v2491_v17 = vld [vmem:[#allocation5 + $0x180] ss:$8 sps:$4 sm:$0xff]   ;;  %v2503_v21 = vld [vmem:[#allocation5 + $0x374] ss:$8 sps:$4 sm:$0xff]   ;;  %v218_v22 = vpack.c.bf16 %v170_v18, %v170_v18  ;;  %v2501_v25 = vld [vmem:[#allocation5 + $0x370] ss:$8 sps:$4 sm:$0xff]  }
  0x67   :  { %v221_v9 = vpack.c.bf16 %v173_v5, %v173_v5  ;;  %1038 = vmatprep.mubr.bf16.mxu0 %v219_v6  ;;  %v220_v23 = vpack.c.bf16 %v172_v19, %v172_v19  ;;  %v2524_v38 = vld [vmem:[#allocation5 + $0x234] ss:$8 sps:$4 sm:$0xff]   ;;  %v2522_v40 = vld [vmem:[#allocation5 + $0x230] ss:$8 sps:$4 sm:$0xff]   ;;  %v2531_v45 = vld [vmem:[#allocation5 + $0x320] ss:$8 sps:$4 sm:$0xff]  }
  0x68   :  { %1019 = vmatpush1.bf16.msra.mxu0 %v2436_v26  ;;  %v2506_v26 = vld [vmem:[#allocation5 + $0x264] ss:$8 sps:$4 sm:$0xff]   ;;  %v2527_v39 = vld [vmem:[#allocation5 + $0x334] ss:$8 sps:$4 sm:$0xff]   ;;  %v2540_v56 = vld [vmem:[#allocation5 + $0x200] ss:$8 sps:$4 sm:$0xff]  }
  0x69   :  { %1060 = vmatpush1.bf16.msra.mxu1 %v2437_v27  ;;  %1020 = vmatprep.subr.bf16.mxu0 %v2438_v28  ;;  %v2509_v27 = vld [vmem:[#allocation5 + $0x364] ss:$8 sps:$4 sm:$0xff]   ;;  %v2504_v28 = vld [vmem:[#allocation5 + $0x260] ss:$8 sps:$4 sm:$0xff]   ;;  %v2548_v60 = vld [vmem:[#allocation5 + $0x2f4] ss:$8 sps:$4 sm:$0xff]  }
  0x6a   :  { %1061 = vmatprep.subr.bf16.mxu1 %v2440_v29  ;;  %1079 = vmatprep.mubr.bf16.mxu1 %v221_v9  ;;  %v2507_v29 = vld [vmem:[#allocation5 + $0x360] ss:$8 sps:$4 sm:$0xff]   ;;  %v2598_v58 = vld [vmem:[#allocation2 + $0xc] ss:$16 sps:$4 sm:$0xff]   ;;  %v2546_v3 = vld [vmem:[#allocation5 + $0x2f0] ss:$8 sps:$4 sm:$0xff]  }
  0x6b   :  { %v2543_v57 = vld [vmem:[#allocation5 + $0x300] ss:$8 sps:$4 sm:$0xff]   ;;  %v2599_v59 = vld [vmem:[#allocation2 + $0x2c] ss:$16 sps:$4 sm:$0xff]  }
  0x6c   :  { %1021 = vmatpush1.bf16.msra.mxu0 %v2442_v30  ;;  %v2512_v30 = vld [vmem:[#allocation5 + $0x254] ss:$8 sps:$4 sm:$0xff]   ;;  %v3035_v1 = vrot.slane %v2599_v59, %v3019_v53  ;;  %v2554_v6 = vld [vmem:[#allocation5 + $0x2e4] ss:$8 sps:$4 sm:$0xff]   ;;  %v2567_v18 = vld [vmem:[#allocation5 + $0x3c0] ss:$8 sps:$4 sm:$0xff]  }
  0x6d   :  { %1062 = vmatpush1.bf16.msra.mxu1 %v2443_v31  ;;  %1022 = vmatprep.subr.bf16.mxu0 %v2444_v32  ;;  %v2515_v31 = vld [vmem:[#allocation5 + $0x354] ss:$8 sps:$4 sm:$0xff]   ;;  %v2510_v32 = vld [vmem:[#allocation5 + $0x250] ss:$8 sps:$4 sm:$0xff]   ;;  %v2629_v59 = vld [vmem:[#allocation7 + $0xe4] ss:$8 sps:$4 sm:$0xff]  }
  0x6e   :  { %1063 = vmatprep.subr.bf16.mxu1 %v2446_v33  ;;  %v2513_v33 = vld [vmem:[#allocation5 + $0x350] ss:$8 sps:$4 sm:$0xff]   ;;  %v2551_v61 = vld [vmem:[#allocation5 + $0x3f4] ss:$8 sps:$4 sm:$0xff]  }
  0x6f   :  { %v2572_v19 = vld [vmem:[#allocation5 + $0x2b4] ss:$8 sps:$4 sm:$0xff]  }
  0x70   :  { %1023 = vmatpush2.bf16.msra.mxu0 %v2448_v34  ;;  %v2518_v34 = vld [vmem:[#allocation5 + $0x244] ss:$8 sps:$4 sm:$0xff]  }
  0x71   :  { %1064 = vmatpush2.bf16.msra.mxu1 %v2449_v35  ;;  %1024 = vmatprep.subr.bf16.mxu0 %v2450_v36  ;;  %v2521_v35 = vld [vmem:[#allocation5 + $0x344] ss:$8 sps:$4 sm:$0xff]   ;;  %v2516_v36 = vld [vmem:[#allocation5 + $0x240] ss:$8 sps:$4 sm:$0xff]  }
  0x72   :  { %1065 = vmatprep.subr.bf16.mxu1 %v2452_v37  ;;  %v2519_v37 = vld [vmem:[#allocation5 + $0x340] ss:$8 sps:$4 sm:$0xff]  }
  0x74   :  { %1025 = vmatpush2.bf16.msra.mxu0 %v2454_v41  ;;  %v2525_v41 = vld [vmem:[#allocation5 + $0x330] ss:$8 sps:$4 sm:$0xff]  }
  0x75   :  { %1066 = vmatpush2.bf16.msra.mxu1 %v2455_v42  ;;  %1026 = vmatprep.subr.bf16.mxu0 %v2456_v43  ;;  %v2530_v42 = vld [vmem:[#allocation5 + $0x224] ss:$8 sps:$4 sm:$0xff]  }
  0x76   :  { %1067 = vmatprep.subr.bf16.mxu1 %v2458_v44  ;;  %v2533_v43 = vld [vmem:[#allocation5 + $0x324] ss:$8 sps:$4 sm:$0xff]   ;;  %v2528_v44 = vld [vmem:[#allocation5 + $0x220] ss:$8 sps:$4 sm:$0xff]  }
  0x78   :  { %1027 = vmatpush2.bf16.msra.mxu0 %v2460_v47  ;;  %v2536_v47 = vld [vmem:[#allocation5 + $0x214] ss:$8 sps:$4 sm:$0xff]  }
  0x79   :  { %1068 = vmatpush2.bf16.msra.mxu1 %v2461_v48  ;;  %1028 = vmatprep.subr.bf16.mxu0 %v2462_v49  ;;  %v2539_v48 = vld [vmem:[#allocation5 + $0x314] ss:$8 sps:$4 sm:$0xff]   ;;  %v2534_v49 = vld [vmem:[#allocation5 + $0x210] ss:$8 sps:$4 sm:$0xff]  }
  0x7a   :  { %1069 = vmatprep.subr.bf16.mxu1 %v2464_v50  ;;  %v2537_v50 = vld [vmem:[#allocation5 + $0x310] ss:$8 sps:$4 sm:$0xff]  }
  0x7c   :  { %1029 = vmatpush2.bf16.msra.mxu0 %v2466_v51  ;;  %v2542_v51 = vld [vmem:[#allocation5 + $0x204] ss:$8 sps:$4 sm:$0xff]  }
  0x7d   :  { %1070 = vmatpush2.bf16.msra.mxu1 %v2467_v52  ;;  %1030 = vmatprep.subr.bf16.mxu0 %v2468_v54  ;;  %v2545_v52 = vld [vmem:[#allocation5 + $0x304] ss:$8 sps:$4 sm:$0xff]   ;;  %v2594_v54 = vld [vmem:[#allocation2 + $0x8] ss:$16 sps:$4 sm:$0xff]  }
  0x7e   :  { %1071 = vmatprep.subr.bf16.mxu1 %v2470_v55  ;;  %v2596_v55 = vld [vmem:[#allocation2 + $0x28] ss:$16 sps:$4 sm:$0xff]   ;;  %v3026_v62 = vrot.slane %v2594_v54, %v3019_v53 }
  0x7f   :  { %v2618_v54 = vld [vmem:[#allocation7 + $0x10] ss:$8 sps:$4 sm:$0xff]  }
  0x80   :  { %1031 = vmatpush2.bf16.msra.mxu0 %v2472_v63  ;;  %v3029_v63 = vrot.slane %v2596_v55, %v3019_v53  ;;  %v2623_v55 = vld [vmem:[#allocation7 + $0x4] ss:$8 sps:$4 sm:$0xff]  }
  0x81   :  { %1072 = vmatpush2.bf16.msra.mxu1 %v2473_v0  ;;  %1032 = vmatprep.subr.bf16.mxu0 %v2474_v2  ;;  %v3032_v0 = vrot.slane %v2598_v58, %v3019_v53  ;;  %v2552_v53 = vld [vmem:[#allocation5 + $0x2e0] ss:$8 sps:$4 sm:$0xff]   ;;  %v2624_v58 = vld [vmem:[#allocation7 + $0xf0] ss:$8 sps:$4 sm:$0xff]  }
  0x82   :  { %1073 = vmatprep.subr.bf16.mxu1 %v2476_v4  ;;  %v207_v2 = vcombine.high %v3026_v62, %v3029_v63  ;;  %v2549_v4 = vld [vmem:[#allocation5 + $0x3f0] ss:$8 sps:$4 sm:$0xff]  }
  0x83   :  { %v209_v5 = vcombine.high %v3032_v0, %v3035_v1 }
  0x84   :  { %1033 = vmatpush2.bf16.msra.mxu0 %v2478_v7  ;;  %v2557_v7 = vld [vmem:[#allocation5 + $0x3e4] ss:$8 sps:$4 sm:$0xff]  }
  0x85   :  { %1074 = vmatpush2.bf16.msra.mxu1 %v2479_v8  ;;  %1034 = vmatprep.subr.bf16.mxu0 %v2480_v10  ;;  %v223_v8 = vpack.c.bf16 %v207_v2, %v207_v2  ;;  %v225_v9 = vpack.c.bf16 %v209_v5, %v209_v5  ;;  %v2555_v10 = vld [vmem:[#allocation5 + $0x3e0] ss:$8 sps:$4 sm:$0xff]   ;;  %v2636_v2 = vld [vmem:[#allocation7 + $0xb0] ss:$8 sps:$4 sm:$0xff]   ;;  %v2644_v5 = vld [vmem:[#allocation7 + $0x94] ss:$8 sps:$4 sm:$0xff]  }
  0x86   :  { %1075 = vmatprep.subr.bf16.mxu1 %v2482_v11  ;;  %v2560_v11 = vld [vmem:[#allocation5 + $0x2d4] ss:$8 sps:$4 sm:$0xff]  }
  0x88   :  { %1035 = vmatpush2.bf16.msra.mxu0 %v2484_v12  ;;  %v2563_v12 = vld [vmem:[#allocation5 + $0x3d4] ss:$8 sps:$4 sm:$0xff]  }
  0x89   :  { %1076 = vmatpush2.bf16.msra.mxu1 %v2485_v13  ;;  %1036 = vmatprep.subr.bf16.mxu0 %v2486_v14  ;;  %v2558_v13 = vld [vmem:[#allocation5 + $0x2d0] ss:$8 sps:$4 sm:$0xff]  }
  0x8a   :  { %1077 = vmatprep.subr.bf16.mxu1 %v2488_v15  ;;  %v2561_v14 = vld [vmem:[#allocation5 + $0x3d0] ss:$8 sps:$4 sm:$0xff]   ;;  %v2566_v15 = vld [vmem:[#allocation5 + $0x2c4] ss:$8 sps:$4 sm:$0xff]  }
  0x8c   :  { %1037 = vmatpush2.bf16.msra.mxu0 %v2490_v16  ;;  %v2569_v16 = vld [vmem:[#allocation5 + $0x3c4] ss:$8 sps:$4 sm:$0xff]  }
  0x8d   :  { %1078 = vmatpush2.bf16.msra.mxu1 %v2491_v17  ;;  %1088 = vmatprep.subr.bf16.mxu0 %v2500_v20  ;;  %v2564_v17 = vld [vmem:[#allocation5 + $0x2c0] ss:$8 sps:$4 sm:$0xff]   ;;  %v2575_v20 = vld [vmem:[#allocation5 + $0x3b4] ss:$8 sps:$4 sm:$0xff]  }
  0x8e   :  { %1129 = vmatprep.subr.bf16.mxu1 %v2503_v21  ;;  %v2570_v21 = vld [vmem:[#allocation5 + $0x2b0] ss:$8 sps:$4 sm:$0xff]  }
  0x8f   :  { %1039 = vmatmul.mubr.bf16.vlgmr.msra.gmra.mxu0 %v218_v22  ;;  %v2573_v22 = vld [vmem:[#allocation5 + $0x3b0] ss:$8 sps:$4 sm:$0xff]  }
  0x90   :  { %1080 = vmatmul.mubr.bf16.vlgmr.msra.gmra.mxu1 %v220_v23  ;;  %1089 = vmatpush1.bf16.msra.mxu0 %v2498_v24  ;;  %v2578_v23 = vld [vmem:[#allocation5 + $0x2a4] ss:$8 sps:$4 sm:$0xff]  }
  0x91   :  { %1130 = vmatpush1.bf16.msra.mxu1 %v2501_v25  ;;  %1090 = vmatprep.subr.bf16.mxu0 %v2506_v26  ;;  %v2581_v24 = vld [vmem:[#allocation5 + $0x3a4] ss:$8 sps:$4 sm:$0xff]   ;;  %v2576_v25 = vld [vmem:[#allocation5 + $0x2a0] ss:$8 sps:$4 sm:$0xff]  }
  0x92   :  { %1131 = vmatprep.subr.bf16.mxu1 %v2509_v27  ;;  %1120 = vmatprep.mubr.bf16.mxu0 %v223_v8  ;;  %v2579_v26 = vld [vmem:[#allocation5 + $0x3a0] ss:$8 sps:$4 sm:$0xff]   ;;  %v2584_v27 = vld [vmem:[#allocation5 + $0x294] ss:$8 sps:$4 sm:$0xff]  }
  0x93   :  { %1161 = vmatprep.mubr.bf16.mxu1 %v225_v9  ;;  %v2645_v8 = vld [vmem:[#allocation7 + $0x80] ss:$8 sps:$4 sm:$0xff]   ;;  %v2648_v9 = vld [vmem:[#allocation8 + $0x70] ss:$8 sps:$4 sm:$0xff]  }
  0x94   :  { %1091 = vmatpush1.bf16.msra.mxu0 %v2504_v28  ;;  %v2587_v28 = vld [vmem:[#allocation5 + $0x394] ss:$8 sps:$4 sm:$0xff]  }
  0x95   :  { %1132 = vmatpush1.bf16.msra.mxu1 %v2507_v29  ;;  %1092 = vmatprep.subr.bf16.mxu0 %v2512_v30  ;;  %v2582_v29 = vld [vmem:[#allocation5 + $0x290] ss:$8 sps:$4 sm:$0xff]  }
  0x96   :  { %1133 = vmatprep.subr.bf16.mxu1 %v2515_v31  ;;  %v2585_v30 = vld [vmem:[#allocation5 + $0x390] ss:$8 sps:$4 sm:$0xff]   ;;  %v2590_v31 = vld [vmem:[#allocation5 + $0x284] ss:$8 sps:$4 sm:$0xff]  }
  0x98   :  { %1093 = vmatpush1.bf16.msra.mxu0 %v2510_v32  ;;  %v2593_v32 = vld [vmem:[#allocation5 + $0x384] ss:$8 sps:$4 sm:$0xff]  }
  0x99   :  { %1134 = vmatpush1.bf16.msra.mxu1 %v2513_v33  ;;  %1094 = vmatprep.subr.bf16.mxu0 %v2518_v34  ;;  %v2588_v33 = vld [vmem:[#allocation5 + $0x280] ss:$8 sps:$4 sm:$0xff]  }
  0x9a   :  { %1135 = vmatprep.subr.bf16.mxu1 %v2521_v35  ;;  %v2591_v34 = vld [vmem:[#allocation5 + $0x380] ss:$8 sps:$4 sm:$0xff]   ;;  %v206_v35 = vcombine.low %v3026_v62, %v3029_v63  ;;  %v2630_v62 = vld [vmem:[#allocation7 + $0xd0] ss:$8 sps:$4 sm:$0xff]   ;;  %v2635_v63 = vld [vmem:[#allocation7 + $0xc4] ss:$8 sps:$4 sm:$0xff]  }
  0x9c   :  { %1095 = vmatpush1.bf16.msra.mxu0 %v2516_v36  ;;  %v208_v36 = vcombine.low %v3032_v0, %v3035_v1  ;;  %v2633_v0 = vld [vmem:[#allocation7 + $0xc0] ss:$8 sps:$4 sm:$0xff]   ;;  %v2638_v1 = vld [vmem:[#allocation7 + $0xb4] ss:$8 sps:$4 sm:$0xff]  }
  0x9d   :  { %1136 = vmatpush1.bf16.msra.mxu1 %v2519_v37  ;;  %1096 = vmatprep.subr.bf16.mxu0 %v2524_v38  ;;  %v222_v37 = vpack.c.bf16 %v206_v35, %v206_v35  ;;  %v2687_v35 = vld [vmem:[#allocation8 + $0xa0] ss:$8 sps:$4 sm:$0xff]  }
  0x9e   :  { %1137 = vmatprep.subr.bf16.mxu1 %v2527_v39  ;;  %v224_v38 = vpack.c.bf16 %v208_v36, %v208_v36  ;;  %v2600_v39 = vld [vmem:[#allocation7 + $0x70] ss:$8 sps:$4 sm:$0xff]  }
  0xa0   :  { %1097 = vmatpush1.bf16.msra.mxu0 %v2522_v40  ;;  %v2602_v40 = vld [vmem:[#allocation7 + $0x74] ss:$8 sps:$4 sm:$0xff]  }
  0xa1   :  { %1138 = vmatpush1.bf16.msra.mxu1 %v2525_v41  ;;  %1098 = vmatprep.subr.bf16.mxu0 %v2530_v42  ;;  %v2605_v41 = vld [vmem:[#allocation7 + $0x64] ss:$8 sps:$4 sm:$0xff]   ;;  %v2603_v42 = vld [vmem:[#allocation7 + $0x60] ss:$8 sps:$4 sm:$0xff]  }
  0xa2   :  { %1139 = vmatprep.subr.bf16.mxu1 %v2533_v43  ;;  %v2608_v43 = vld [vmem:[#allocation7 + $0x54] ss:$8 sps:$4 sm:$0xff]  }
  0xa4   :  { %1099 = vmatpush1.bf16.msra.mxu0 %v2528_v44  ;;  %v2606_v44 = vld [vmem:[#allocation7 + $0x50] ss:$8 sps:$4 sm:$0xff]  }
  0xa5   :  { %1140 = vmatpush1.bf16.msra.mxu1 %v2531_v45  ;;  %1100 = vmatprep.subr.bf16.mxu0 %v2536_v47  ;;  %v2611_v45 = vld [vmem:[#allocation7 + $0x44] ss:$8 sps:$4 sm:$0xff]   ;;  %v2609_v47 = vld [vmem:[#allocation7 + $0x40] ss:$8 sps:$4 sm:$0xff]  }
  0xa6   :  { %1141 = vmatprep.subr.bf16.mxu1 %v2539_v48  ;;  %v2614_v48 = vld [vmem:[#allocation7 + $0x34] ss:$8 sps:$4 sm:$0xff]  }
  0xa8   :  { %1101 = vmatpush1.bf16.msra.mxu0 %v2534_v49  ;;  %v2612_v49 = vld [vmem:[#allocation7 + $0x30] ss:$8 sps:$4 sm:$0xff]  }
  0xa9   :  { %1142 = vmatpush1.bf16.msra.mxu1 %v2537_v50  ;;  %1102 = vmatprep.subr.bf16.mxu0 %v2542_v51  ;;  %v2617_v50 = vld [vmem:[#allocation7 + $0x24] ss:$8 sps:$4 sm:$0xff]   ;;  %v2615_v51 = vld [vmem:[#allocation7 + $0x20] ss:$8 sps:$4 sm:$0xff]  }
  0xaa   :  { %1143 = vmatprep.subr.bf16.mxu1 %v2545_v52  ;;  %v2620_v52 = vld [vmem:[#allocation7 + $0x14] ss:$8 sps:$4 sm:$0xff]  }
  0xac   :  { %1103 = vmatpush1.bf16.msra.mxu0 %v2540_v56  ;;  %v2621_v56 = vld [vmem:[#allocation7] ss:$8 sps:$4 sm:$0xff]  }
  0xad   :  { %1144 = vmatpush1.bf16.msra.mxu1 %v2543_v57  ;;  %1104 = vmatprep.subr.bf16.mxu0 %v2548_v60  ;;  %v2626_v57 = vld [vmem:[#allocation7 + $0xf4] ss:$8 sps:$4 sm:$0xff]   ;;  %v2627_v60 = vld [vmem:[#allocation7 + $0xe0] ss:$8 sps:$4 sm:$0xff]  }
  0xae   :  { %1145 = vmatprep.subr.bf16.mxu1 %v2551_v61  ;;  %v2632_v61 = vld [vmem:[#allocation7 + $0xd4] ss:$8 sps:$4 sm:$0xff]  }
  0xb0   :  { %1105 = vmatpush2.bf16.msra.mxu0 %v2546_v3  ;;  %v2641_v3 = vld [vmem:[#allocation7 + $0xa4] ss:$8 sps:$4 sm:$0xff]  }
  0xb1   :  { %1146 = vmatpush2.bf16.msra.mxu1 %v2549_v4  ;;  %1106 = vmatprep.subr.bf16.mxu0 %v2554_v6  ;;  %v2639_v4 = vld [vmem:[#allocation7 + $0xa0] ss:$8 sps:$4 sm:$0xff]   ;;  %v2642_v6 = vld [vmem:[#allocation7 + $0x90] ss:$8 sps:$4 sm:$0xff]  }
  0xb2   :  { %1147 = vmatprep.subr.bf16.mxu1 %v2557_v7  ;;  %v2647_v7 = vld [vmem:[#allocation7 + $0x84] ss:$8 sps:$4 sm:$0xff]  }
  0xb4   :  { %1107 = vmatpush2.bf16.msra.mxu0 %v2552_v53  ;;  %v2650_v53 = vld [vmem:[#allocation8 + $0x74] ss:$8 sps:$4 sm:$0xff]  }
  0xb5   :  { %1148 = vmatpush2.bf16.msra.mxu1 %v2555_v10  ;;  %1108 = vmatprep.subr.bf16.mxu0 %v2560_v11  ;;  %v2653_v10 = vld [vmem:[#allocation8 + $0x64] ss:$8 sps:$4 sm:$0xff]   ;;  %v2651_v11 = vld [vmem:[#allocation8 + $0x60] ss:$8 sps:$4 sm:$0xff]  }
  0xb6   :  { %1149 = vmatprep.subr.bf16.mxu1 %v2563_v12  ;;  %v2656_v12 = vld [vmem:[#allocation8 + $0x54] ss:$8 sps:$4 sm:$0xff]  }
  0xb8   :  { %1109 = vmatpush2.bf16.msra.mxu0 %v2558_v13  ;;  %v2654_v13 = vld [vmem:[#allocation8 + $0x50] ss:$8 sps:$4 sm:$0xff]  }
  0xb9   :  { %1150 = vmatpush2.bf16.msra.mxu1 %v2561_v14  ;;  %1110 = vmatprep.subr.bf16.mxu0 %v2566_v15  ;;  %v2659_v14 = vld [vmem:[#allocation8 + $0x44] ss:$8 sps:$4 sm:$0xff]   ;;  %v2657_v15 = vld [vmem:[#allocation8 + $0x40] ss:$8 sps:$4 sm:$0xff]  }
  0xba   :  { %1151 = vmatprep.subr.bf16.mxu1 %v2569_v16  ;;  %v2662_v16 = vld [vmem:[#allocation8 + $0x34] ss:$8 sps:$4 sm:$0xff]  }
  0xbc   :  { %1111 = vmatpush2.bf16.msra.mxu0 %v2564_v17  ;;  %v2660_v17 = vld [vmem:[#allocation8 + $0x30] ss:$8 sps:$4 sm:$0xff]  }
  0xbd   :  { %1152 = vmatpush2.bf16.msra.mxu1 %v2567_v18  ;;  %1112 = vmatprep.subr.bf16.mxu0 %v2572_v19  ;;  %v2665_v18 = vld [vmem:[#allocation8 + $0x24] ss:$8 sps:$4 sm:$0xff]   ;;  %v2663_v19 = vld [vmem:[#allocation8 + $0x20] ss:$8 sps:$4 sm:$0xff]  }
  0xbe   :  { %1153 = vmatprep.subr.bf16.mxu1 %v2575_v20  ;;  %v2668_v20 = vld [vmem:[#allocation8 + $0x14] ss:$8 sps:$4 sm:$0xff]  }
  0xc0   :  { %1113 = vmatpush2.bf16.msra.mxu0 %v2570_v21  ;;  %v2666_v21 = vld [vmem:[#allocation8 + $0x10] ss:$8 sps:$4 sm:$0xff]  }
  0xc1   :  { %1154 = vmatpush2.bf16.msra.mxu1 %v2573_v22  ;;  %1114 = vmatprep.subr.bf16.mxu0 %v2578_v23  ;;  %v2671_v22 = vld [vmem:[#allocation8 + $0x4] ss:$8 sps:$4 sm:$0xff]   ;;  %v2669_v23 = vld [vmem:[#allocation8] ss:$8 sps:$4 sm:$0xff]  }
  0xc2   :  { %1155 = vmatprep.subr.bf16.mxu1 %v2581_v24  ;;  %v2674_v24 = vld [vmem:[#allocation8 + $0xf4] ss:$8 sps:$4 sm:$0xff]  }
  0xc4   :  { %1115 = vmatpush2.bf16.msra.mxu0 %v2576_v25  ;;  %v2672_v25 = vld [vmem:[#allocation8 + $0xf0] ss:$8 sps:$4 sm:$0xff]  }
  0xc5   :  { %1156 = vmatpush2.bf16.msra.mxu1 %v2579_v26  ;;  %1116 = vmatprep.subr.bf16.mxu0 %v2584_v27  ;;  %v2677_v26 = vld [vmem:[#allocation8 + $0xe4] ss:$8 sps:$4 sm:$0xff]   ;;  %v2675_v27 = vld [vmem:[#allocation8 + $0xe0] ss:$8 sps:$4 sm:$0xff]  }
  0xc6   :  { %1157 = vmatprep.subr.bf16.mxu1 %v2587_v28  ;;  %v2680_v28 = vld [vmem:[#allocation8 + $0xd4] ss:$8 sps:$4 sm:$0xff]  }
  0xc8   :  { %1117 = vmatpush2.bf16.msra.mxu0 %v2582_v29  ;;  %v2678_v29 = vld [vmem:[#allocation8 + $0xd0] ss:$8 sps:$4 sm:$0xff]  }
  0xc9   :  { %1158 = vmatpush2.bf16.msra.mxu1 %v2585_v30  ;;  %1118 = vmatprep.subr.bf16.mxu0 %v2590_v31  ;;  %v2683_v30 = vld [vmem:[#allocation8 + $0xc4] ss:$8 sps:$4 sm:$0xff]   ;;  %v2681_v31 = vld [vmem:[#allocation8 + $0xc0] ss:$8 sps:$4 sm:$0xff]  }
  0xca   :  { %1159 = vmatprep.subr.bf16.mxu1 %v2593_v32  ;;  %v2686_v32 = vld [vmem:[#allocation8 + $0xb4] ss:$8 sps:$4 sm:$0xff]  }
  0xcc   :  { %1119 = vmatpush2.bf16.msra.mxu0 %v2588_v33  ;;  %v2684_v33 = vld [vmem:[#allocation8 + $0xb0] ss:$8 sps:$4 sm:$0xff]  }
  0xcd   :  { %1160 = vmatpush2.bf16.msra.mxu1 %v2591_v34  ;;  %1378 = vmatprep.subr.bf16.mxu0 %v2602_v40  ;;  %v2689_v34 = vld [vmem:[#allocation8 + $0xa4] ss:$8 sps:$4 sm:$0xff]  }
  0xce   :  { %1627 = vmatprep.subr.bf16.mxu1 %v2650_v53  ;;  %v2696_v53 = vld [vmem:[#allocation10 + $0x70] ss:$8 sps:$4 sm:$0xff]  }
  0xcf   :  { %1121 = vmatmul.mubr.bf16.vlgmr.msra.gmra.mxu0 %v222_v37 }
  0xd0   :  { %1162 = vmatmul.mubr.bf16.vlgmr.msra.gmra.mxu1 %v224_v38  ;;  %1379 = vmatpush1.bf16.msra.mxu0 %v2600_v39 }
  0xd1   :  { %1380 = vmatprep.subr.bf16.mxu0 %v2605_v41  ;;  %1628 = vmatpush1.bf16.msra.mxu1 %v2648_v9  ;;  %v2693_v9 = vld [vmem:[#allocation8 + $0x80] ss:$8 sps:$4 sm:$0xff]  }
  0xd2   :  { %1629 = vmatprep.subr.bf16.mxu1 %v2653_v10  ;;  %v2698_v10 = vld [vmem:[#allocation10 + $0x74] ss:$8 sps:$4 sm:$0xff]  }
  0xd4   :  { %1381 = vmatpush1.bf16.msra.mxu0 %v2603_v42 }
  0xd5   :  { %1382 = vmatprep.subr.bf16.mxu0 %v2608_v43  ;;  %1630 = vmatpush1.bf16.msra.mxu1 %v2651_v11  ;;  %v2701_v11 = vld [vmem:[#allocation10 + $0x64] ss:$8 sps:$4 sm:$0xff]  }
  0xd6   :  { %1631 = vmatprep.subr.bf16.mxu1 %v2656_v12  ;;  %v2699_v12 = vld [vmem:[#allocation10 + $0x60] ss:$8 sps:$4 sm:$0xff]  }
  0xd8   :  { %1383 = vmatpush1.bf16.msra.mxu0 %v2606_v44  ;;  %v3046_v44 = vsub.s32 0, %v3016_v46 }
  0xd9   :  { %1384 = vmatprep.subr.bf16.mxu0 %v2611_v45  ;;  %1632 = vmatpush1.bf16.msra.mxu1 %v2654_v13  ;;  %v354_v45 = vld [vmem:[%s3079_s2] sm:$0x3]  ;;  %v2704_v13 = vld [vmem:[#allocation10 + $0x54] ss:$8 sps:$4 sm:$0xff]  }
  0xda   :  { %1633 = vmatprep.subr.bf16.mxu1 %v2659_v14  ;;  %v2702_v14 = vld [vmem:[#allocation10 + $0x50] ss:$8 sps:$4 sm:$0xff]  }
  0xdc   :  { %1385 = vmatpush1.bf16.msra.mxu0 %v2609_v47  ;;  %v3052_v47 = vsub.s32 1, %v3016_v46 }
  0xdd   :  { %1386 = vmatprep.subr.bf16.mxu0 %v2614_v48  ;;  %1634 = vmatpush1.bf16.msra.mxu1 %v2657_v15  ;;  %v359_v48 = vrot.slane %v354_v45, %v3046_v44  ;;  %v2707_v15 = vld [vmem:[#allocation10 + $0x44] ss:$8 sps:$4 sm:$0xff]  }
  0xde   :  { %1635 = vmatprep.subr.bf16.mxu1 %v2662_v16  ;;  %v2705_v16 = vld [vmem:[#allocation10 + $0x40] ss:$8 sps:$4 sm:$0xff]  }
  0xe0   :  { %1387 = vmatpush1.bf16.msra.mxu0 %v2612_v49  ;;  %v363_v49 = vrot.slane %v354_v45, %v3052_v47 }
  0xe1   :  { %1388 = vmatprep.subr.bf16.mxu0 %v2617_v50  ;;  %1636 = vmatpush1.bf16.msra.mxu1 %v2660_v17  ;;  %v2710_v17 = vld [vmem:[#allocation10 + $0x34] ss:$8 sps:$4 sm:$0xff]  }
  0xe2   :  { %1637 = vmatprep.subr.bf16.mxu1 %v2665_v18  ;;  %v2708_v18 = vld [vmem:[#allocation10 + $0x30] ss:$8 sps:$4 sm:$0xff]  }
  0xe4   :  { %1389 = vmatpush1.bf16.msra.mxu0 %v2615_v51 }
  0xe5   :  { %1390 = vmatprep.subr.bf16.mxu0 %v2620_v52  ;;  %1638 = vmatpush1.bf16.msra.mxu1 %v2663_v19  ;;  %v2713_v19 = vld [vmem:[#allocation10 + $0x24] ss:$8 sps:$4 sm:$0xff]  }
  0xe6   :  { %1639 = vmatprep.subr.bf16.mxu1 %v2668_v20  ;;  %v2711_v20 = vld [vmem:[#allocation10 + $0x20] ss:$8 sps:$4 sm:$0xff]  }
  0xe8   :  { %1391 = vmatpush1.bf16.msra.mxu0 %v2618_v54 }
  0xe9   :  { %1392 = vmatprep.subr.bf16.mxu0 %v2623_v55  ;;  %1640 = vmatpush1.bf16.msra.mxu1 %v2666_v21  ;;  %v2716_v21 = vld [vmem:[#allocation10 + $0x14] ss:$8 sps:$4 sm:$0xff]  }
  0xea   :  { %1641 = vmatprep.subr.bf16.mxu1 %v2671_v22  ;;  %v2714_v22 = vld [vmem:[#allocation10 + $0x10] ss:$8 sps:$4 sm:$0xff]  }
  0xec   :  { %1393 = vmatpush1.bf16.msra.mxu0 %v2621_v56 }
  0xed   :  { %1394 = vmatprep.subr.bf16.mxu0 %v2626_v57  ;;  %1642 = vmatpush1.bf16.msra.mxu1 %v2669_v23  ;;  %v2719_v23 = vld [vmem:[#allocation10 + $0x4] ss:$8 sps:$4 sm:$0xff]  }
  0xee   :  { %1643 = vmatprep.subr.bf16.mxu1 %v2674_v24  ;;  %v2717_v24 = vld [vmem:[#allocation10] ss:$8 sps:$4 sm:$0xff]  }
  0xf0   :  { %1395 = vmatpush2.bf16.msra.mxu0 %v2624_v58 }
  0xf1   :  { %1396 = vmatprep.subr.bf16.mxu0 %v2629_v59  ;;  %1644 = vmatpush2.bf16.msra.mxu1 %v2672_v25  ;;  %v2722_v25 = vld [vmem:[#allocation10 + $0xf4] ss:$8 sps:$4 sm:$0xff]  }
  0xf2   :  { %1645 = vmatprep.subr.bf16.mxu1 %v2677_v26  ;;  %v2720_v26 = vld [vmem:[#allocation10 + $0xf0] ss:$8 sps:$4 sm:$0xff]  }
  0xf4   :  { %1397 = vmatpush2.bf16.msra.mxu0 %v2627_v60 }
  0xf5   :  { %1398 = vmatprep.subr.bf16.mxu0 %v2632_v61  ;;  %1646 = vmatpush2.bf16.msra.mxu1 %v2675_v27  ;;  %v2725_v27 = vld [vmem:[#allocation10 + $0xe4] ss:$8 sps:$4 sm:$0xff]  }
  0xf6   :  { %1647 = vmatprep.subr.bf16.mxu1 %v2680_v28  ;;  %v2723_v28 = vld [vmem:[#allocation10 + $0xe0] ss:$8 sps:$4 sm:$0xff]  }
  0xf8   :  { %1399 = vmatpush2.bf16.msra.mxu0 %v2630_v62 }
  0xf9   :  { %1400 = vmatprep.subr.bf16.mxu0 %v2635_v63  ;;  %1648 = vmatpush2.bf16.msra.mxu1 %v2678_v29  ;;  %v2728_v29 = vld [vmem:[#allocation10 + $0xd4] ss:$8 sps:$4 sm:$0xff]  }
  0xfa   :  { %1649 = vmatprep.subr.bf16.mxu1 %v2683_v30  ;;  %v2726_v30 = vld [vmem:[#allocation10 + $0xd0] ss:$8 sps:$4 sm:$0xff]  }
  0xfc   :  { %1401 = vmatpush2.bf16.msra.mxu0 %v2633_v0 }
  0xfd   :  { %1402 = vmatprep.subr.bf16.mxu0 %v2638_v1  ;;  %1650 = vmatpush2.bf16.msra.mxu1 %v2681_v31  ;;  %v2731_v31 = vld [vmem:[#allocation10 + $0xc4] ss:$8 sps:$4 sm:$0xff]  }
  0xfe   :  { %1651 = vmatprep.subr.bf16.mxu1 %v2686_v32  ;;  %v2729_v32 = vld [vmem:[#allocation10 + $0xc0] ss:$8 sps:$4 sm:$0xff]  }
 0x100   :  { %1403 = vmatpush2.bf16.msra.mxu0 %v2636_v2 }
 0x101   :  { %1404 = vmatprep.subr.bf16.mxu0 %v2641_v3  ;;  %1652 = vmatpush2.bf16.msra.mxu1 %v2684_v33  ;;  %v2734_v33 = vld [vmem:[#allocation10 + $0xb4] ss:$8 sps:$4 sm:$0xff]  }
 0x102   :  { %1653 = vmatprep.subr.bf16.mxu1 %v2689_v34  ;;  %v2732_v34 = vld [vmem:[#allocation10 + $0xb0] ss:$8 sps:$4 sm:$0xff]  }
 0x104   :  { %1405 = vmatpush2.bf16.msra.mxu0 %v2639_v4 }
 0x105   :  { %1406 = vmatprep.subr.bf16.mxu0 %v2644_v5  ;;  %1654 = vmatpush2.bf16.msra.mxu1 %v2687_v35  ;;  %v2737_v35 = vld [vmem:[#allocation10 + $0xa4] ss:$8 sps:$4 sm:$0xff]  }
 0x108   :  { %1407 = vmatpush2.bf16.msra.mxu0 %v2642_v6  ;;  %v2692_v6 = vld [vmem:[#allocation8 + $0x94] ss:$8 sps:$4 sm:$0xff]  }
 0x109   :  { %1408 = vmatprep.subr.bf16.mxu0 %v2647_v7  ;;  %v2690_v7 = vld [vmem:[#allocation8 + $0x90] ss:$8 sps:$4 sm:$0xff]   ;;  %1655 = vmatprep.subr.bf16.mxu1 %v2692_v6 }
 0x10a   :  { %1656 = vmatpush2.bf16.msra.mxu1 %v2690_v7 }
 0x10c   :  { %1409 = vmatpush2.bf16.msra.mxu0 %v2645_v8  ;;  %v2695_v8 = vld [vmem:[#allocation8 + $0x84] ss:$8 sps:$4 sm:$0xff]  }
 0x10d   :  { %1657 = vmatprep.subr.bf16.mxu1 %v2695_v8  ;;  %1876 = vmatprep.subr.bf16.mxu0 %v2698_v10 }
 0x10e   :  { %1658 = vmatpush2.bf16.msra.mxu1 %v2693_v9 }
 0x14f   :  { %v1040_v36 = vpop.f32.mrf.mxu0 }
 0x150   :  { %v1081_v37 = vpop.f32.mrf.mxu1  ;;  %v1041_v50 = vadd.f32 %v1040_v36, %v359_v48  ;;  %v2735_v36 = vld [vmem:[#allocation10 + $0xa0] ss:$8 sps:$4 sm:$0xff]  }
 0x151   :  { %v1042_v38 = vpop.f32.mrf.mxu0 }
 0x152   :  { %v1083_v39 = vpop.f32.mrf.mxu1  ;;  %v1043_v51 = vadd.f32 %v1042_v38, %v363_v49  ;;  %v1082_v52 = vadd.f32 %v1081_v37, %v1041_v50  ;;  %v1206_v37 = vld [vmem:[%s3081_s4] sm:$0x3] }
 0x153   :  { %v1044_v40 = vpop.f32.mrf.mxu0  ;;  %v1211_v38 = vrot.slane %v1206_v37, %v3046_v44 }
 0x154   :  { %v1085_v41 = vpop.f32.mrf.mxu1  ;;  %v1084_v56 = vadd.f32 %v1083_v39, %v1043_v51  ;;  %v1215_v39 = vrot.slane %v1206_v37, %v3052_v47 }
 0x155   :  { %v1045_v42 = vpop.f32.mrf.mxu0 }
 0x156   :  { %v1086_v43 = vpop.f32.mrf.mxu1 }
 0x18f   :  { %v1122_v54 = vpop.f32.mrf.mxu0 }
 0x190   :  { %v1163_v55 = vpop.f32.mrf.mxu1  ;;  %v1123_v57 = vadd.f32 %v1122_v54, %v1082_v52  ;;  %v2740_v54 = vld [vmem:[#allocation10 + $0x94] ss:$8 sps:$4 sm:$0xff]  }
 0x191   :  { %v1124_v58 = vpop.f32.mrf.mxu0 }
 0x192   :  { %v1165_v59 = vpop.f32.mrf.mxu1  ;;  %v1164_v60 = vadd.f32 %v1163_v55, %v1123_v57  ;;  %v1125_v61 = vadd.f32 %v1124_v58, %v1084_v56  ;;  %v2738_v55 = vld [vmem:[#allocation10 + $0x90] ss:$8 sps:$4 sm:$0xff]   ;;  %v2743_v56 = vld [vmem:[#allocation10 + $0x84] ss:$8 sps:$4 sm:$0xff]   ;;  %v2741_v57 = vld [vmem:[#allocation10 + $0x80] ss:$8 sps:$4 sm:$0xff]  }
 0x193   :  { %v1126_v62 = vpop.f32.mrf.mxu0  ;;  %v2744_v58 = vld [vmem:[#allocation11 + $0x78] sm:$0xff]  }
 0x194   :  { %v1167_v63 = vpop.f32.mrf.mxu1  ;;  %v1166_v0 = vadd.f32 %v1165_v59, %v1125_v61  ;;  %v1170_v46 = vmax.f32 %v1164_v60, 0.0  ;;  %v2745_v59 = vld [vmem:[#allocation11 + $0x38] sm:$0xff]   ;;  %v2746_v60 = vld [vmem:[#allocation11 + $0x70] sm:$0xff]   ;;  %2358 = vmatprep.subr.bf16.mxu1 %v2744_v58  ;;  %v2748_v62 = vld [vmem:[#allocation11 + $0x68] sm:$0xff]  }
 0x195   :  { %v1127_v1 = vpop.f32.mrf.mxu0  ;;  %v2747_v61 = vld [vmem:[#allocation11 + $0x30] sm:$0xff]   ;;  %v2749_v63 = vld [vmem:[#allocation11 + $0x28] sm:$0xff]  }
 0x196   :  { %v1168_v2 = vpop.f32.mrf.mxu1  ;;  %v1171_v3 = vmax.f32 %v1166_v0, 0.0  ;;  %v1172_v5 = vpack.c.bf16 %v1170_v46, %v1170_v46  ;;  %v2750_v0 = vld [vmem:[#allocation11 + $0x60] sm:$0xff]   ;;  %v2752_v1 = vld [vmem:[#allocation11 + $0x58] sm:$0xff]  }
 0x197   :  { %v2751_v46 = vld [vmem:[#allocation11 + $0x20] sm:$0xff]   ;;  %v2753_v2 = vld [vmem:[#allocation11 + $0x18] sm:$0xff]  }
 0x198   :  { %v1173_v4 = vpack.c.bf16 %v1171_v3, %v1171_v3  ;;  %v2754_v3 = vld [vmem:[#allocation11 + $0x50] sm:$0xff]  }
 0x19a   :  { %1410 = vmatprep.mubr.bf16.mxu0 %v1173_v4  ;;  %v2755_v4 = vld [vmem:[#allocation11 + $0x10] sm:$0xff]  }
 0x19b   :  { %1411 = vmatmul.mubr.bf16.vlgmr.msra.gmra.mxu0 %v1172_v5  ;;  %v1455_v5 = vld [vmem:[%s3083_s6] sm:$0x3] }
 0x19c   :  { %1877 = vmatpush1.bf16.msra.mxu0 %v2696_v53  ;;  %v1460_v6 = vrot.slane %v1455_v5, %v3046_v44  ;;  %v1464_v7 = vrot.slane %v1455_v5, %v3052_v47 }
 0x19d   :  { %1878 = vmatprep.subr.bf16.mxu0 %v2701_v11 }
 0x1a0   :  { %1879 = vmatpush1.bf16.msra.mxu0 %v2699_v12 }
 0x1a1   :  { %1880 = vmatprep.subr.bf16.mxu0 %v2704_v13 }
 0x1a4   :  { %1881 = vmatpush1.bf16.msra.mxu0 %v2702_v14 }
 0x1a5   :  { %1882 = vmatprep.subr.bf16.mxu0 %v2707_v15 }
 0x1a8   :  { %1883 = vmatpush1.bf16.msra.mxu0 %v2705_v16 }
 0x1a9   :  { %1884 = vmatprep.subr.bf16.mxu0 %v2710_v17  ;;  %v2756_v17 = vld [vmem:[#allocation11 + $0x48] sm:$0xff]  }
 0x1ac   :  { %1885 = vmatpush1.bf16.msra.mxu0 %v2708_v18  ;;  %v2757_v18 = vld [vmem:[#allocation11 + $0x8] sm:$0xff]  }
 0x1ad   :  { %1886 = vmatprep.subr.bf16.mxu0 %v2713_v19  ;;  %v2758_v19 = vld [vmem:[#allocation11 + $0x40] sm:$0xff]  }
 0x1b0   :  { %1887 = vmatpush1.bf16.msra.mxu0 %v2711_v20  ;;  %v2759_v20 = vld [vmem:[#allocation11] sm:$0xff]  }
 0x1b1   :  { %1888 = vmatprep.subr.bf16.mxu0 %v2716_v21  ;;  %v1704_v21 = vld [vmem:[%s3085_s8] sm:$0x3] }
 0x1b4   :  { %1889 = vmatpush1.bf16.msra.mxu0 %v2714_v22  ;;  %v1709_v22 = vrot.slane %v1704_v21, %v3046_v44 }
 0x1b5   :  { %1890 = vmatprep.subr.bf16.mxu0 %v2719_v23  ;;  %v1713_v23 = vrot.slane %v1704_v21, %v3052_v47 }
 0x1b8   :  { %1891 = vmatpush1.bf16.msra.mxu0 %v2717_v24 }
 0x1b9   :  { %1892 = vmatprep.subr.bf16.mxu0 %v2722_v25 }
 0x1bc   :  { %1893 = vmatpush2.bf16.msra.mxu0 %v2720_v26 }
 0x1bd   :  { %1894 = vmatprep.subr.bf16.mxu0 %v2725_v27 }
 0x1c0   :  { %1895 = vmatpush2.bf16.msra.mxu0 %v2723_v28 }
 0x1c1   :  { %1896 = vmatprep.subr.bf16.mxu0 %v2728_v29 }
 0x1c4   :  { %1897 = vmatpush2.bf16.msra.mxu0 %v2726_v30 }
 0x1c5   :  { %1898 = vmatprep.subr.bf16.mxu0 %v2731_v31 }
 0x1c8   :  { %1899 = vmatpush2.bf16.msra.mxu0 %v2729_v32 }
 0x1c9   :  { %1900 = vmatprep.subr.bf16.mxu0 %v2734_v33 }
 0x1cc   :  { %1901 = vmatpush2.bf16.msra.mxu0 %v2732_v34 }
 0x1cd   :  { %1902 = vmatprep.subr.bf16.mxu0 %v2737_v35  ;;  %v2341_v35 = vld [vmem:[%s3087_s10] ss:$0 sm:$0xff] }
 0x1d0   :  { %1903 = vmatpush2.bf16.msra.mxu0 %v2735_v36 }
 0x1d1   :  { %1904 = vmatprep.subr.bf16.mxu0 %v2740_v54 }
 0x1d4   :  { %1905 = vmatpush2.bf16.msra.mxu0 %v2738_v55 }
 0x1d5   :  { %1906 = vmatprep.subr.bf16.mxu0 %v2743_v56 }
 0x1d8   :  { %1907 = vmatpush2.bf16.msra.mxu0 %v2741_v57 }
 0x25b   :  { %v1412_v40 = vpop.f32.mrf.mxu0 }
 0x25c   :  { %v1413_v41 = vadd.f32 %v1412_v40, %v1211_v38 }
 0x25d   :  { %v1414_v42 = vpop.f32.mrf.mxu0 }
 0x25e   :  { %v1415_v43 = vadd.f32 %v1414_v42, %v1215_v39  ;;  %v1419_v45 = vmax.f32 %v1413_v41, 0.0 }
 0x25f   :  { %v1416_v48 = vpop.f32.mrf.mxu0 }
 0x260   :  { %v1420_v49 = vmax.f32 %v1415_v43, 0.0  ;;  %v1421_v52 = vpack.c.bf16 %v1419_v45, %v1419_v45 }
 0x261   :  { %v1417_v50 = vpop.f32.mrf.mxu0 }
 0x262   :  { %v1422_v51 = vpack.c.bf16 %v1420_v49, %v1420_v49 }
 0x264   :  { %1659 = vmatprep.mubr.bf16.mxu1 %v1422_v51 }
 0x265   :  { %1660 = vmatmul.mubr.bf16.vlgmr.msra.gmra.mxu1 %v1421_v52 }
 0x266   :  { %2359 = vmatpush3.bf16.msra.mxu1 %v2745_v59 }
 0x267   :  { %2360 = vmatprep.subr.bf16.mxu1 %v2746_v60 }
 0x26a   :  { %2361 = vmatpush3.bf16.msra.mxu1 %v2747_v61 }
 0x26b   :  { %2362 = vmatprep.subr.bf16.mxu1 %v2748_v62 }
 0x26e   :  { %2363 = vmatpush3.bf16.msra.mxu1 %v2749_v63 }
 0x26f   :  { %2364 = vmatprep.subr.bf16.mxu1 %v2750_v0 }
 0x272   :  { %2365 = vmatpush3.bf16.msra.mxu1 %v2751_v46 }
 0x273   :  { %2366 = vmatprep.subr.bf16.mxu1 %v2752_v1 }
 0x276   :  { %2367 = vmatpush3.bf16.msra.mxu1 %v2753_v2 }
 0x277   :  { %2368 = vmatprep.subr.bf16.mxu1 %v2754_v3 }
 0x27a   :  { %2369 = vmatpush3.bf16.msra.mxu1 %v2755_v4 }
 0x27b   :  { %2370 = vmatprep.subr.bf16.mxu1 %v2756_v17 }
 0x27e   :  { %2371 = vmatpush3.bf16.msra.mxu1 %v2757_v18 }
 0x27f   :  { %2372 = vmatprep.subr.bf16.mxu1 %v2758_v19 }
 0x282   :  { %2373 = vmatpush3.bf16.msra.mxu1 %v2759_v20 }
 0x325   :  { %v1661_v8 = vpop.f32.mrf.mxu1 }
 0x326   :  { %v1662_v9 = vadd.f32 %v1661_v8, %v1460_v6 }
 0x327   :  { %v1663_v53 = vpop.f32.mrf.mxu1 }
 0x328   :  { %v1664_v10 = vadd.f32 %v1663_v53, %v1464_v7  ;;  %v1668_v11 = vmax.f32 %v1662_v9, 0.0 }
 0x329   :  { %v1665_v12 = vpop.f32.mrf.mxu1 }
 0x32a   :  { %v1669_v13 = vmax.f32 %v1664_v10, 0.0  ;;  %v1670_v16 = vpack.c.bf16 %v1668_v11, %v1668_v11 }
 0x32b   :  { %v1666_v14 = vpop.f32.mrf.mxu1 }
 0x32c   :  { %v1671_v15 = vpack.c.bf16 %v1669_v13, %v1669_v13 }
 0x32e   :  { %1908 = vmatprep.mubr.bf16.mxu0 %v1671_v15 }
 0x32f   :  { %1909 = vmatmul.mubr.bf16.vlgmr.msra.gmra.mxu0 %v1670_v16 }
 0x3ef   :  { %v1910_v24 = vpop.f32.mrf.mxu0 }
 0x3f0   :  { %v1911_v25 = vadd.f32 %v1910_v24, %v1709_v22 }
 0x3f1   :  { %v1912_v26 = vpop.f32.mrf.mxu0 }
 0x3f2   :  { %v1913_v27 = vadd.f32 %v1912_v26, %v1713_v23  ;;  %v1917_v28 = vmax.f32 %v1911_v25, 0.0 }
 0x3f3   :  { %v1914_v29 = vpop.f32.mrf.mxu0 }
 0x3f4   :  { %v1918_v30 = vmax.f32 %v1913_v27, 0.0  ;;  %v1919_v33 = vpack.c.bf16 %v1917_v28, %v1917_v28 }
 0x3f5   :  { %v1915_v31 = vpop.f32.mrf.mxu0 }
 0x3f6   :  { %v1920_v32 = vpack.c.bf16 %v1918_v30, %v1918_v30 }
 0x3f8   :  { %2088 = vmatprep.mubr.bf16.mxu1 %v1920_v32 }
 0x3f9   :  { %2089 = vmatmul.mubr.bf16.vlgmr.msra.gmra.mxu1 %v1919_v33 }
 0x4b9   :  { %v2374_v34 = vpop.f32.mrf.mxu1 }
 0x4bb   :  { %v2375_v44 = vpop.f32.mrf.mxu1 }
 0x4bc   :  { %v2376_v36 = vadd.f32 %v2375_v44, %v2374_v34 }
 0x4bd   :  { %v2377_v47 = vpop.f32.mrf.mxu1 }
 0x4be   :  { %v2091_v37 = vadd.f32 %v2376_v36, %v2341_v35 }
 0x4bf   :  { %v2378_v38 = vpop.f32.mrf.mxu1 }
 0x4c0   :  { %2096 = vst [vmem:[#allocation13] sm:$0xff] %v2091_v37 }
 0x4c1   :  { %2101 = vsyncadd [#allocation4], 96  ;;  %s2923_s8 = smov [#allocation13]  }
 0x4c2   :  { %s2102_s16 = sshll.u32 %s2923_s8, 4  ;;  %s2103_s16 = int_to_ptr.vmem [resolvable:$true] %s2102_s16 }
 0x4c3   :  { %s2880_s17 = scalar_lea.vmem %s2103_s16, 32  ;;  %s2884_s18 = scalar_lea.vmem %s2103_s16, 128 }
 0x4c4   :  { %p2881_p2 = scmp.ne.s32.totalorder %s2103_s16, %s2880_s17  ;;  %p2885_p3 = scmp.lt.s32.totalorder %s2103_s16, %s2103_s16 }
 0x4c5   :  { %p2886_p4 = scmp.lt.s32.totalorder %s2884_s18, %s2880_s17 }
 0x4c7   :  { %p2887_p5 = por %p2886_p4, %p2885_p3 }
 0x4c9   :  { %p2888_p6 = pnand %p2887_p5, %p2881_p2 }
 0x4cb   :  { %2891 = shalt.err (!%p2888_p6)
}
 0x4cc   :  { %s2924_s19 = smov 32   ;;  %s2925_s10 = smov 2  }
 0x4cd   :  { %2108 = dma.vmem_to_hbm [thread:$0]  %s2103_s16, 32, %s3088_s11, [#allocation4], %s2924_s19, %s2924_s19, %s2925_s10  }
 0x4ce   :  { %2908 = dma.done.wait [#allocation4], 128  }
 0x4cf   :  { %2909 = vsyncadd [#allocation4], 4294967168 }
 0x4d0   :  { %2112 = vsyncpa [#allocation3], 1 }
 0x4d1   :  { %2113 = vsyncpa [#allocation6], 1 }
 0x4d2   :  { %2114 = vsyncpa [#allocation9], 1 }
 0x4d3   :  { %2115 = vsyncpa [#allocation12], 1 }
 0x4d4   :  { %2116 = vsyncpa [#allocation4], 1 }

// kernel: tpu_custom_call.1
= control target key start
LH: loop header
LB: loop body
LE: loop exit
PB: predicated region body
PF: predicated region fallthrough
CT: control target
= control target key end

     0   :  { %16 = vsyncpa [#allocation3], 0  ;;  %s3077_s0 = inlined_call_operand.hbm [shape: f32[2,1024], index: 0, kind: input, shape index: {}]   ;;  %s3078_s1 = inlined_call_operand.hbm [shape: bf16[1024,256], index: 1, kind: input, shape index: {}]   ;;  %s3079_s2 = inlined_call_operand.vmem [shape: f32[1,256], index: 2, kind: input, shape index: {}]   ;;  %s3080_s3 = inlined_call_operand.hbm [shape: bf16[256,256], index: 3, kind: input, shape index: {}]   ;;  %s3081_s4 = inlined_call_operand.vmem [shape: f32[1,256], index: 4, kind: input, shape index: {}]   ;;  %s3082_s5 = inlined_call_operand.hbm [shape: bf16[256,256], index: 5, kind: input, shape index: {}]   ;;  %s3083_s6 = inlined_call_operand.vmem [shape: f32[1,256], index: 6, kind: input, shape index: {}]   ;;  %s3084_s7 = inlined_call_operand.hbm [shape: bf16[256,256], index: 7, kind: input, shape index: {}]   ;;  %s3085_s8 = inlined_call_operand.vmem [shape: f32[1,256], index: 8, kind: input, shape index: {}]   ;;  %s3086_s9 = inlined_call_operand.hbm [shape: bf16[256,128], index: 9, kind: input, shape index: {}]   ;;  %s3087_s10 = inlined_call_operand.vmem [shape: f32[1,128], index: 10, kind: input, shape index: {}]   ;;  %s3088_s11 = inlined_call_operand.hbm [shape: f32[2,128], index: 11, kind: output, shape index: {}]  }
   0x1   :  { %17 = vsyncpa [#allocation6], 0 }
   0x2   :  { %18 = vsyncpa [#allocation9], 0 }
   0x3   :  { %19 = vsyncpa [#allocation12], 0 }
   0x4   :  { %20 = vsyncpa [#allocation4], 0 }
   0x5   :  { %25 = vsyncadd [#allocation3], 768  ;;  %s2910_s17 = smov [#allocation5]  }
   0x6   :  { %s38_s18 = sshll.u32 %s2910_s17, 4  ;;  %s39_s18 = int_to_ptr.vmem [resolvable:$true] %s38_s18 }
   0x7   :  { %s2768_s19 = scalar_lea.vmem %s39_s18, 16384  ;;  %p2773_p1 = scmp.lt.s32.totalorder %s39_s18, %s39_s18 }
   0x8   :  { %p2769_p0 = scmp.ne.s32.totalorder %s39_s18, %s2768_s19  ;;  %p2774_p2 = scmp.lt.s32.totalorder %s2768_s19, %s2768_s19 }
   0xa   :  { %p2775_p3 = por %p2774_p2, %p2773_p1 }
   0xc   :  { %p2776_p4 = pnand %p2775_p3, %p2769_p0 }
   0xe   :  { %2779 = shalt.err (!%p2776_p4)
}
   0xf   :  { %s2911_s20 = smov 128   ;;  %s2912_s21 = smov 8  }
  0x10   :  { %44 = dma.hbm_to_vmem [thread:$0]  %s3078_s1, 16384, %s39_s18, [#allocation6], %s2911_s20, %s2911_s20, %s2912_s21  }
  0x11   :  { %s2913_s24 = smov [#allocation8]   ;;  %s2914_s26 = smov [#allocation2]  }
  0x12   :  { %s66_s25 = sshll.u32 %s2913_s24, 4  ;;  %s26_s27 = sshll.u32 %s2914_s26, 4  ;;  %s67_s25 = int_to_ptr.vmem [resolvable:$true] %s66_s25  ;;  %s27_s27 = int_to_ptr.vmem [resolvable:$true] %s26_s27 }
  0x13   :  { %s2788_s28 = scalar_lea.vmem %s67_s25, 4096  ;;  %p2793_p6 = scmp.lt.s32.totalorder %s67_s25, %s67_s25 }
  0x14   :  { %p2789_p5 = scmp.ne.s32.totalorder %s67_s25, %s2788_s28  ;;  %p2794_p7 = scmp.lt.s32.totalorder %s2788_s28, %s2788_s28 }
  0x16   :  { %p2795_p8 = por %p2794_p7, %p2793_p6 }
  0x18   :  { %p2796_p9 = pnand %p2795_p8, %p2789_p5 }
  0x1a   :  { %2799 = shalt.err (!%p2796_p9)
}
  0x1b   :  { %72 = dma.hbm_to_vmem [thread:$0]  %s3082_s5, 4096, %s67_s25, [#allocation9], %s2911_s20, %s2911_s20, %s2912_s21  }
  0x1c   :  { %s2808_s1 = scalar_lea.vmem %s27_s27, 256  ;;  %s2812_s12 = scalar_lea.vmem %s27_s27, 1024 }
  0x1d   :  { %p2809_p10 = scmp.ne.s32.totalorder %s27_s27, %s2808_s1  ;;  %p2813_p11 = scmp.lt.s32.totalorder %s27_s27, %s27_s27 }
  0x1e   :  { %p2814_p12 = scmp.lt.s32.totalorder %s2812_s12, %s2808_s1 }
  0x20   :  { %p2815_p13 = por %p2814_p12, %p2813_p11 }
  0x22   :  { %p2816_p0 = pnand %p2815_p13, %p2809_p10 }
  0x24   :  { %2819 = shalt.err (!%p2816_p0)
}
  0x25   :  { %s2915_s13 = smov 256   ;;  %s2916_s14 = smov 16  }
  0x26   :  { %32 = dma.hbm_to_vmem [thread:$0]  %s3077_s0, 256, %s27_s27, [#allocation3], %s2915_s13, %s2915_s13, %s2916_s14  }
  0x27   :  { %s2917_s17 = smov [#allocation7]   ;;  %s2918_s19 = smov [#allocation10]  }
  0x28   :  { %s52_s18 = sshll.u32 %s2917_s17, 4  ;;  %s80_s5 = sshll.u32 %s2918_s19, 4  ;;  %s53_s18 = int_to_ptr.vmem [resolvable:$true] %s52_s18  ;;  %s81_s5 = int_to_ptr.vmem [resolvable:$true] %s80_s5 }
  0x29   :  { %s2828_s22 = scalar_lea.vmem %s53_s18, 4096  ;;  %p2833_p2 = scmp.lt.s32.totalorder %s53_s18, %s53_s18 }
  0x2a   :  { %p2829_p1 = scmp.ne.s32.totalorder %s53_s18, %s2828_s22  ;;  %p2834_p3 = scmp.lt.s32.totalorder %s2828_s22, %s2828_s22 }
  0x2c   :  { %p2835_p4 = por %p2834_p3, %p2833_p2 }
  0x2e   :  { %p2836_p5 = pnand %p2835_p4, %p2829_p1 }
  0x30   :  { %2839 = shalt.err (!%p2836_p5)
}
  0x31   :  { %58 = dma.hbm_to_vmem [thread:$0]  %s3080_s3, 4096, %s53_s18, [#allocation6], %s2911_s20, %s2911_s20, %s2912_s21  }
  0x32   :  { %s2848_s0 = scalar_lea.vmem %s81_s5, 4096  ;;  %p2853_p7 = scmp.lt.s32.totalorder %s81_s5, %s81_s5 }
  0x33   :  { %p2849_p6 = scmp.ne.s32.totalorder %s81_s5, %s2848_s0  ;;  %p2854_p8 = scmp.lt.s32.totalorder %s2848_s0, %s2848_s0 }
  0x35   :  { %p2855_p9 = por %p2854_p8, %p2853_p7 }
  0x37   :  { %p2856_p10 = pnand %p2855_p9, %p2849_p6 }
  0x39   :  { %2859 = shalt.err (!%p2856_p10)
}
  0x3a   :  { %86 = dma.hbm_to_vmem [thread:$0]  %s3084_s7, 4096, %s81_s5, [#allocation9], %s2911_s20, %s2911_s20, %s2912_s21  }
  0x3b   :  { %s2919_s27 = smov [#allocation11]  }
  0x3c   :  { %s94_s28 = sshll.u32 %s2919_s27, 4  ;;  %s95_s28 = int_to_ptr.vmem [resolvable:$true] %s94_s28 }
  0x3d   :  { %s2868_s29 = scalar_lea.vmem %s95_s28, 2048  ;;  %p2873_p12 = scmp.lt.s32.totalorder %s95_s28, %s95_s28 }
  0x3e   :  { %p2869_p11 = scmp.ne.s32.totalorder %s95_s28, %s2868_s29  ;;  %p2874_p13 = scmp.lt.s32.totalorder %s2868_s29, %s2868_s29 }
  0x40   :  { %p2875_p0 = por %p2874_p13, %p2873_p12 }
  0x42   :  { %p2876_p1 = pnand %p2875_p0, %p2869_p11 }
  0x44   :  { %2879 = shalt.err (!%p2876_p1)
}
  0x45   :  { %s2920_s3 = smov 64   ;;  %s2921_s30 = smov 4  }
  0x46   :  { %100 = dma.hbm_to_vmem [thread:$0]  %s3086_s9, 2048, %s95_s28, [#allocation12], %s2920_s3, %s2920_s3, %s2921_s30  }
  0x47   :  { %2900 = dma.done.wait [#allocation3], 1024  }
  0x48   :  { %2901 = vsyncadd [#allocation3], 4294966272 }
  0x49   :  { %2902 = dma.done.wait [#allocation6], 20480  }
  0x4a   :  { %2903 = vsyncadd [#allocation6], 4294946816 }
  0x4b   :  { %2904 = dma.done.wait [#allocation9], 8192  }
  0x4c   :  { %2905 = vsyncadd [#allocation9], 4294959104 }
  0x4d   :  { %2906 = dma.done.wait [#allocation12], 2048  }
  0x4e   :  { %2907 = vsyncadd [#allocation12], 4294965248  ;;  %v2396_v0 = vld [vmem:[#allocation5 + $0x74] ss:$8 sps:$4 sm:$0xff]   ;;  %v2400_v2 = vld [vmem:[#allocation5 + $0x70] ss:$8 sps:$4 sm:$0xff]   ;;  %v145_v40 = vlaneseq }
  0x4f   :  { %v2398_v1 = vld [vmem:[#allocation5 + $0x174] ss:$8 sps:$4 sm:$0xff]   ;;  %1006 = vmatprep.subr.bf16.mxu0 %v2396_v0  ;;  %v2401_v3 = vld [vmem:[#allocation5 + $0x170] ss:$8 sps:$4 sm:$0xff]   ;;  %v2402_v4 = vld [vmem:[#allocation5 + $0x64] ss:$8 sps:$4 sm:$0xff]  }
  0x50   :  { %1047 = vmatprep.subr.bf16.mxu1 %v2398_v1  ;;  %1007 = vmatpush1.bf16.msra.mxu0 %v2400_v2  ;;  %v2404_v5 = vld [vmem:[#allocation5 + $0x164] ss:$8 sps:$4 sm:$0xff]   ;;  %v2406_v6 = vld [vmem:[#allocation5 + $0x60] ss:$8 sps:$4 sm:$0xff]   ;;  %v2408_v8 = vld [vmem:[#allocation5 + $0x54] ss:$8 sps:$4 sm:$0xff]  }
  0x51   :  { %1048 = vmatpush1.bf16.msra.mxu1 %v2401_v3  ;;  %1008 = vmatprep.subr.bf16.mxu0 %v2402_v4  ;;  %v2407_v7 = vld [vmem:[#allocation5 + $0x160] ss:$8 sps:$4 sm:$0xff]   ;;  %v2410_v9 = vld [vmem:[#allocation5 + $0x154] ss:$8 sps:$4 sm:$0xff]   ;;  %v2412_v10 = vld [vmem:[#allocation5 + $0x50] ss:$8 sps:$4 sm:$0xff]  }
  0x52   :  { %1049 = vmatprep.subr.bf16.mxu1 %v2404_v5  ;;  %v2413_v11 = vld [vmem:[#allocation5 + $0x150] ss:$8 sps:$4 sm:$0xff]   ;;  %v2414_v12 = vld [vmem:[#allocation5 + $0x44] ss:$8 sps:$4 sm:$0xff]   ;;  %v2418_v14 = vld [vmem:[#allocation5 + $0x40] ss:$8 sps:$4 sm:$0xff]  }
  0x53   :  { %v2416_v13 = vld [vmem:[#allocation5 + $0x144] ss:$8 sps:$4 sm:$0xff]   ;;  %v2419_v15 = vld [vmem:[#allocation5 + $0x140] ss:$8 sps:$4 sm:$0xff]   ;;  %v2420_v16 = vld [vmem:[#allocation5 + $0x34] ss:$8 sps:$4 sm:$0xff]  }
  0x54   :  { %1009 = vmatpush1.bf16.msra.mxu0 %v2406_v6  ;;  %v2422_v17 = vld [vmem:[#allocation5 + $0x134] ss:$8 sps:$4 sm:$0xff]   ;;  %v2424_v18 = vld [vmem:[#allocation5 + $0x30] ss:$8 sps:$4 sm:$0xff]   ;;  %v2426_v20 = vld [vmem:[#allocation5 + $0x24] ss:$8 sps:$4 sm:$0xff]  }
  0x55   :  { %1050 = vmatpush1.bf16.msra.mxu1 %v2407_v7  ;;  %1010 = vmatprep.subr.bf16.mxu0 %v2408_v8  ;;  %v2425_v19 = vld [vmem:[#allocation5 + $0x130] ss:$8 sps:$4 sm:$0xff]   ;;  %v2428_v21 = vld [vmem:[#allocation5 + $0x124] ss:$8 sps:$4 sm:$0xff]   ;;  %v2430_v22 = vld [vmem:[#allocation5 + $0x20] ss:$8 sps:$4 sm:$0xff]  }
  0x56   :  { %1051 = vmatprep.subr.bf16.mxu1 %v2410_v9  ;;  %v2431_v23 = vld [vmem:[#allocation5 + $0x120] ss:$8 sps:$4 sm:$0xff]   ;;  %v2432_v24 = vld [vmem:[#allocation5 + $0x14] ss:$8 sps:$4 sm:$0xff]   ;;  %v2436_v26 = vld [vmem:[#allocation5 + $0x10] ss:$8 sps:$4 sm:$0xff]  }
  0x57   :  { %v2434_v25 = vld [vmem:[#allocation5 + $0x114] ss:$8 sps:$4 sm:$0xff]   ;;  %v2437_v27 = vld [vmem:[#allocation5 + $0x110] ss:$8 sps:$4 sm:$0xff]   ;;  %v2438_v28 = vld [vmem:[#allocation5 + $0x4] ss:$8 sps:$4 sm:$0xff]  }
  0x58   :  { %1011 = vmatpush1.bf16.msra.mxu0 %v2412_v10  ;;  %v2440_v29 = vld [vmem:[#allocation5 + $0x104] ss:$8 sps:$4 sm:$0xff]   ;;  %v2442_v30 = vld [vmem:[#allocation5] ss:$8 sps:$4 sm:$0xff]   ;;  %v2444_v32 = vld [vmem:[#allocation5 + $0xf4] ss:$8 sps:$4 sm:$0xff]  }
  0x59   :  { %1052 = vmatpush1.bf16.msra.mxu1 %v2413_v11  ;;  %1012 = vmatprep.subr.bf16.mxu0 %v2414_v12  ;;  %v2443_v31 = vld [vmem:[#allocation5 + $0x100] ss:$8 sps:$4 sm:$0xff]   ;;  %v2446_v33 = vld [vmem:[#allocation5 + $0x1f4] ss:$8 sps:$4 sm:$0xff]   ;;  %v2448_v34 = vld [vmem:[#allocation5 + $0xf0] ss:$8 sps:$4 sm:$0xff]  }
  0x5a   :  { %1053 = vmatprep.subr.bf16.mxu1 %v2416_v13  ;;  %v2449_v35 = vld [vmem:[#allocation5 + $0x1f0] ss:$8 sps:$4 sm:$0xff]   ;;  %v2450_v36 = vld [vmem:[#allocation5 + $0xe4] ss:$8 sps:$4 sm:$0xff]   ;;  %v2922_v38 = vmov 1983009808  }
  0x5b   :  { %v2452_v37 = vld [vmem:[#allocation5 + $0x1e4] ss:$8 sps:$4 sm:$0xff]   ;;  %v143_v39 = vunpack.c.l.s4 %v2922_v38  ;;  %v2454_v41 = vld [vmem:[#allocation5 + $0xe0] ss:$8 sps:$4 sm:$0xff]   ;;  %v2456_v43 = vld [vmem:[#allocation5 + $0xd4] ss:$8 sps:$4 sm:$0xff]  }
  0x5c   :  { %1013 = vmatpush1.bf16.msra.mxu0 %v2418_v14  ;;  %v2455_v42 = vld [vmem:[#allocation5 + $0x1e0] ss:$8 sps:$4 sm:$0xff]   ;;  %v2458_v44 = vld [vmem:[#allocation5 + $0x1d4] ss:$8 sps:$4 sm:$0xff]   ;;  %v3016_v46 = vshrl.u32 %v145_v40, 7 }
  0x5d   :  { %1054 = vmatpush1.bf16.msra.mxu1 %v2419_v15  ;;  %1014 = vmatprep.subr.bf16.mxu0 %v2420_v16  ;;  %v144_v45 = vunpack.c.0.s8 %v143_v39  ;;  %v2460_v47 = vld [vmem:[#allocation5 + $0xd0] ss:$8 sps:$4 sm:$0xff]   ;;  %v2462_v49 = vld [vmem:[#allocation5 + $0xc4] ss:$8 sps:$4 sm:$0xff]   ;;  %v2466_v51 = vld [vmem:[#allocation5 + $0xc0] ss:$8 sps:$4 sm:$0xff]  }
  0x5e   :  { %1055 = vmatprep.subr.bf16.mxu1 %v2422_v17  ;;  %v2461_v48 = vld [vmem:[#allocation5 + $0x1d0] ss:$8 sps:$4 sm:$0xff]   ;;  %v2464_v50 = vld [vmem:[#allocation5 + $0x1c4] ss:$8 sps:$4 sm:$0xff]   ;;  %v2467_v52 = vld [vmem:[#allocation5 + $0x1c0] ss:$8 sps:$4 sm:$0xff]  }
  0x5f   :  { %v3019_v53 = vsub.s32 %v144_v45, %v3016_v46  ;;  %v2468_v54 = vld [vmem:[#allocation5 + $0xb4] ss:$8 sps:$4 sm:$0xff]   ;;  %v2492_v56 = vld [vmem:[#allocation2] ss:$16 sps:$4 sm:$0xff]   ;;  %v2474_v2 = vld [vmem:[#allocation5 + $0xa4] ss:$8 sps:$4 sm:$0xff]  }
  0x60   :  { %1015 = vmatpush1.bf16.msra.mxu0 %v2424_v18  ;;  %v2470_v55 = vld [vmem:[#allocation5 + $0x1b4] ss:$8 sps:$4 sm:$0xff]   ;;  %v2494_v57 = vld [vmem:[#allocation2 + $0x20] ss:$16 sps:$4 sm:$0xff]   ;;  %v2476_v4 = vld [vmem:[#allocation5 + $0x1a4] ss:$8 sps:$4 sm:$0xff]  }
  0x61   :  { %1056 = vmatpush1.bf16.msra.mxu1 %v2425_v19  ;;  %1016 = vmatprep.subr.bf16.mxu0 %v2426_v20  ;;  %v2496_v58 = vld [vmem:[#allocation2 + $0x4] ss:$16 sps:$4 sm:$0xff]   ;;  %v148_v60 = vrot.slane %v2492_v56, %v3019_v53  ;;  %v162_v61 = vrot.slane %v2494_v57, %v3019_v53  ;;  %v2472_v63 = vld [vmem:[#allocation5 + $0xb0] ss:$8 sps:$4 sm:$0xff]   ;;  %v2478_v7 = vld [vmem:[#allocation5 + $0xa0] ss:$8 sps:$4 sm:$0xff]  }
  0x62   :  { %1057 = vmatprep.subr.bf16.mxu1 %v2428_v21  ;;  %v2497_v59 = vld [vmem:[#allocation2 + $0x24] ss:$16 sps:$4 sm:$0xff]   ;;  %v155_v62 = vrot.slane %v2496_v58, %v3019_v53  ;;  %v2473_v0 = vld [vmem:[#allocation5 + $0x1b0] ss:$8 sps:$4 sm:$0xff]   ;;  %v2479_v8 = vld [vmem:[#allocation5 + $0x1a0] ss:$8 sps:$4 sm:$0xff]  }
  0x63   :  { %v169_v1 = vrot.slane %v2497_v59, %v3019_v53  ;;  %v171_v3 = vcombine.high %v148_v60, %v162_v61  ;;  %v2480_v10 = vld [vmem:[#allocation5 + $0x94] ss:$8 sps:$4 sm:$0xff]   ;;  %v2484_v12 = vld [vmem:[#allocation5 + $0x90] ss:$8 sps:$4 sm:$0xff]   ;;  %v2486_v14 = vld [vmem:[#allocation5 + $0x84] ss:$8 sps:$4 sm:$0xff]   ;;  %v170_v18 = vcombine.low %v148_v60, %v162_v61 }
  0x64   :  { %1017 = vmatpush1.bf16.msra.mxu0 %v2430_v22  ;;  %v2482_v11 = vld [vmem:[#allocation5 + $0x194] ss:$8 sps:$4 sm:$0xff]   ;;  %v2485_v13 = vld [vmem:[#allocation5 + $0x190] ss:$8 sps:$4 sm:$0xff]   ;;  %v2488_v15 = vld [vmem:[#allocation5 + $0x184] ss:$8 sps:$4 sm:$0xff]  }
  0x65   :  { %1058 = vmatpush1.bf16.msra.mxu1 %v2431_v23  ;;  %1018 = vmatprep.subr.bf16.mxu0 %v2432_v24  ;;  %v173_v5 = vcombine.high %v155_v62, %v169_v1  ;;  %v219_v6 = vpack.c.bf16 %v171_v3, %v171_v3  ;;  %v2490_v16 = vld [vmem:[#allocation5 + $0x80] ss:$8 sps:$4 sm:$0xff]   ;;  %v172_v19 = vcombine.low %v155_v62, %v169_v1  ;;  %v2500_v20 = vld [vmem:[#allocation5 + $0x274] ss:$8 sps:$4 sm:$0xff]   ;;  %v2498_v24 = vld [vmem:[#allocation5 + $0x270] ss:$8 sps:$4 sm:$0xff]  }
  0x66   :  { %1059 = vmatprep.subr.bf16.mxu1 %v2434_v25  ;;  %v2491_v17 = vld [vmem:[#allocation5 + $0x180] ss:$8 sps:$4 sm:$0xff]   ;;  %v2503_v21 = vld [vmem:[#allocation5 + $0x374] ss:$8 sps:$4 sm:$0xff]   ;;  %v218_v22 = vpack.c.bf16 %v170_v18, %v170_v18  ;;  %v2501_v25 = vld [vmem:[#allocation5 + $0x370] ss:$8 sps:$4 sm:$0xff]  }
  0x67   :  { %v221_v9 = vpack.c.bf16 %v173_v5, %v173_v5  ;;  %1038 = vmatprep.mubr.bf16.mxu0 %v219_v6  ;;  %v220_v23 = vpack.c.bf16 %v172_v19, %v172_v19  ;;  %v2524_v38 = vld [vmem:[#allocation5 + $0x234] ss:$8 sps:$4 sm:$0xff]   ;;  %v2522_v40 = vld [vmem:[#allocation5 + $0x230] ss:$8 sps:$4 sm:$0xff]   ;;  %v2531_v45 = vld [vmem:[#allocation5 + $0x320] ss:$8 sps:$4 sm:$0xff]  }
  0x68   :  { %1019 = vmatpush1.bf16.msra.mxu0 %v2436_v26  ;;  %v2506_v26 = vld [vmem:[#allocation5 + $0x264] ss:$8 sps:$4 sm:$0xff]   ;;  %v2527_v39 = vld [vmem:[#allocation5 + $0x334] ss:$8 sps:$4 sm:$0xff]   ;;  %v2540_v56 = vld [vmem:[#allocation5 + $0x200] ss:$8 sps:$4 sm:$0xff]  }
  0x69   :  { %1060 = vmatpush1.bf16.msra.mxu1 %v2437_v27  ;;  %1020 = vmatprep.subr.bf16.mxu0 %v2438_v28  ;;  %v2509_v27 = vld [vmem:[#allocation5 + $0x364] ss:$8 sps:$4 sm:$0xff]   ;;  %v2504_v28 = vld [vmem:[#allocation5 + $0x260] ss:$8 sps:$4 sm:$0xff]   ;;  %v2548_v60 = vld [vmem:[#allocation5 + $0x2f4] ss:$8 sps:$4 sm:$0xff]  }
  0x6a   :  { %1061 = vmatprep.subr.bf16.mxu1 %v2440_v29  ;;  %1079 = vmatprep.mubr.bf16.mxu1 %v221_v9  ;;  %v2507_v29 = vld [vmem:[#allocation5 + $0x360] ss:$8 sps:$4 sm:$0xff]   ;;  %v2598_v58 = vld [vmem:[#allocation2 + $0xc] ss:$16 sps:$4 sm:$0xff]   ;;  %v2546_v3 = vld [vmem:[#allocation5 + $0x2f0] ss:$8 sps:$4 sm:$0xff]  }
  0x6b   :  { %v2543_v57 = vld [vmem:[#allocation5 + $0x300] ss:$8 sps:$4 sm:$0xff]   ;;  %v2599_v59 = vld [vmem:[#allocation2 + $0x2c] ss:$16 sps:$4 sm:$0xff]  }
  0x6c   :  { %1021 = vmatpush1.bf16.msra.mxu0 %v2442_v30  ;;  %v2512_v30 = vld [vmem:[#allocation5 + $0x254] ss:$8 sps:$4 sm:$0xff]   ;;  %v3035_v1 = vrot.slane %v2599_v59, %v3019_v53  ;;  %v2554_v6 = vld [vmem:[#allocation5 + $0x2e4] ss:$8 sps:$4 sm:$0xff]   ;;  %v2567_v18 = vld [vmem:[#allocation5 + $0x3c0] ss:$8 sps:$4 sm:$0xff]  }
  0x6d   :  { %1062 = vmatpush1.bf16.msra.mxu1 %v2443_v31  ;;  %1022 = vmatprep.subr.bf16.mxu0 %v2444_v32  ;;  %v2515_v31 = vld [vmem:[#allocation5 + $0x354] ss:$8 sps:$4 sm:$0xff]   ;;  %v2510_v32 = vld [vmem:[#allocation5 + $0x250] ss:$8 sps:$4 sm:$0xff]   ;;  %v2629_v59 = vld [vmem:[#allocation7 + $0xe4] ss:$8 sps:$4 sm:$0xff]  }
  0x6e   :  { %1063 = vmatprep.subr.bf16.mxu1 %v2446_v33  ;;  %v2513_v33 = vld [vmem:[#allocation5 + $0x350] ss:$8 sps:$4 sm:$0xff]   ;;  %v2551_v61 = vld [vmem:[#allocation5 + $0x3f4] ss:$8 sps:$4 sm:$0xff]  }
  0x6f   :  { %v2572_v19 = vld [vmem:[#allocation5 + $0x2b4] ss:$8 sps:$4 sm:$0xff]  }
  0x70   :  { %1023 = vmatpush2.bf16.msra.mxu0 %v2448_v34  ;;  %v2518_v34 = vld [vmem:[#allocation5 + $0x244] ss:$8 sps:$4 sm:$0xff]  }
  0x71   :  { %1064 = vmatpush2.bf16.msra.mxu1 %v2449_v35  ;;  %1024 = vmatprep.subr.bf16.mxu0 %v2450_v36  ;;  %v2521_v35 = vld [vmem:[#allocation5 + $0x344] ss:$8 sps:$4 sm:$0xff]   ;;  %v2516_v36 = vld [vmem:[#allocation5 + $0x240] ss:$8 sps:$4 sm:$0xff]  }
  0x72   :  { %1065 = vmatprep.subr.bf16.mxu1 %v2452_v37  ;;  %v2519_v37 = vld [vmem:[#allocation5 + $0x340] ss:$8 sps:$4 sm:$0xff]  }
  0x74   :  { %1025 = vmatpush2.bf16.msra.mxu0 %v2454_v41  ;;  %v2525_v41 = vld [vmem:[#allocation5 + $0x330] ss:$8 sps:$4 sm:$0xff]  }
  0x75   :  { %1066 = vmatpush2.bf16.msra.mxu1 %v2455_v42  ;;  %1026 = vmatprep.subr.bf16.mxu0 %v2456_v43  ;;  %v2530_v42 = vld [vmem:[#allocation5 + $0x224] ss:$8 sps:$4 sm:$0xff]  }
  0x76   :  { %1067 = vmatprep.subr.bf16.mxu1 %v2458_v44  ;;  %v2533_v43 = vld [vmem:[#allocation5 + $0x324] ss:$8 sps:$4 sm:$0xff]   ;;  %v2528_v44 = vld [vmem:[#allocation5 + $0x220] ss:$8 sps:$4 sm:$0xff]  }
  0x78   :  { %1027 = vmatpush2.bf16.msra.mxu0 %v2460_v47  ;;  %v2536_v47 = vld [vmem:[#allocation5 + $0x214] ss:$8 sps:$4 sm:$0xff]  }
  0x79   :  { %1068 = vmatpush2.bf16.msra.mxu1 %v2461_v48  ;;  %1028 = vmatprep.subr.bf16.mxu0 %v2462_v49  ;;  %v2539_v48 = vld [vmem:[#allocation5 + $0x314] ss:$8 sps:$4 sm:$0xff]   ;;  %v2534_v49 = vld [vmem:[#allocation5 + $0x210] ss:$8 sps:$4 sm:$0xff]  }
  0x7a   :  { %1069 = vmatprep.subr.bf16.mxu1 %v2464_v50  ;;  %v2537_v50 = vld [vmem:[#allocation5 + $0x310] ss:$8 sps:$4 sm:$0xff]  }
  0x7c   :  { %1029 = vmatpush2.bf16.msra.mxu0 %v2466_v51  ;;  %v2542_v51 = vld [vmem:[#allocation5 + $0x204] ss:$8 sps:$4 sm:$0xff]  }
  0x7d   :  { %1070 = vmatpush2.bf16.msra.mxu1 %v2467_v52  ;;  %1030 = vmatprep.subr.bf16.mxu0 %v2468_v54  ;;  %v2545_v52 = vld [vmem:[#allocation5 + $0x304] ss:$8 sps:$4 sm:$0xff]   ;;  %v2594_v54 = vld [vmem:[#allocation2 + $0x8] ss:$16 sps:$4 sm:$0xff]  }
  0x7e   :  { %1071 = vmatprep.subr.bf16.mxu1 %v2470_v55  ;;  %v2596_v55 = vld [vmem:[#allocation2 + $0x28] ss:$16 sps:$4 sm:$0xff]   ;;  %v3026_v62 = vrot.slane %v2594_v54, %v3019_v53 }
  0x7f   :  { %v2618_v54 = vld [vmem:[#allocation7 + $0x10] ss:$8 sps:$4 sm:$0xff]  }
  0x80   :  { %1031 = vmatpush2.bf16.msra.mxu0 %v2472_v63  ;;  %v3029_v63 = vrot.slane %v2596_v55, %v3019_v53  ;;  %v2623_v55 = vld [vmem:[#allocation7 + $0x4] ss:$8 sps:$4 sm:$0xff]  }
  0x81   :  { %1072 = vmatpush2.bf16.msra.mxu1 %v2473_v0  ;;  %1032 = vmatprep.subr.bf16.mxu0 %v2474_v2  ;;  %v3032_v0 = vrot.slane %v2598_v58, %v3019_v53  ;;  %v2552_v53 = vld [vmem:[#allocation5 + $0x2e0] ss:$8 sps:$4 sm:$0xff]   ;;  %v2624_v58 = vld [vmem:[#allocation7 + $0xf0] ss:$8 sps:$4 sm:$0xff]  }
  0x82   :  { %1073 = vmatprep.subr.bf16.mxu1 %v2476_v4  ;;  %v207_v2 = vcombine.high %v3026_v62, %v3029_v63  ;;  %v2549_v4 = vld [vmem:[#allocation5 + $0x3f0] ss:$8 sps:$4 sm:$0xff]  }
  0x83   :  { %v209_v5 = vcombine.high %v3032_v0, %v3035_v1 }
  0x84   :  { %1033 = vmatpush2.bf16.msra.mxu0 %v2478_v7  ;;  %v2557_v7 = vld [vmem:[#allocation5 + $0x3e4] ss:$8 sps:$4 sm:$0xff]  }
  0x85   :  { %1074 = vmatpush2.bf16.msra.mxu1 %v2479_v8  ;;  %1034 = vmatprep.subr.bf16.mxu0 %v2480_v10  ;;  %v223_v8 = vpack.c.bf16 %v207_v2, %v207_v2  ;;  %v225_v9 = vpack.c.bf16 %v209_v5, %v209_v5  ;;  %v2555_v10 = vld [vmem:[#allocation5 + $0x3e0] ss:$8 sps:$4 sm:$0xff]   ;;  %v2636_v2 = vld [vmem:[#allocation7 + $0xb0] ss:$8 sps:$4 sm:$0xff]   ;;  %v2644_v5 = vld [vmem:[#allocation7 + $0x94] ss:$8 sps:$4 sm:$0xff]  }
  0x86   :  { %1075 = vmatprep.subr.bf16.mxu1 %v2482_v11  ;;  %v2560_v11 = vld [vmem:[#allocation5 + $0x2d4] ss:$8 sps:$4 sm:$0xff]  }
  0x88   :  { %1035 = vmatpush2.bf16.msra.mxu0 %v2484_v12  ;;  %v2563_v12 = vld [vmem:[#allocation5 + $0x3d4] ss:$8 sps:$4 sm:$0xff]  }
  0x89   :  { %1076 = vmatpush2.bf16.msra.mxu1 %v2485_v13  ;;  %1036 = vmatprep.subr.bf16.mxu0 %v2486_v14  ;;  %v2558_v13 = vld [vmem:[#allocation5 + $0x2d0] ss:$8 sps:$4 sm:$0xff]  }
  0x8a   :  { %1077 = vmatprep.subr.bf16.mxu1 %v2488_v15  ;;  %v2561_v14 = vld [vmem:[#allocation5 + $0x3d0] ss:$8 sps:$4 sm:$0xff]   ;;  %v2566_v15 = vld [vmem:[#allocation5 + $0x2c4] ss:$8 sps:$4 sm:$0xff]  }
  0x8c   :  { %1037 = vmatpush2.bf16.msra.mxu0 %v2490_v16  ;;  %v2569_v16 = vld [vmem:[#allocation5 + $0x3c4] ss:$8 sps:$4 sm:$0xff]  }
  0x8d   :  { %1078 = vmatpush2.bf16.msra.mxu1 %v2491_v17  ;;  %1088 = vmatprep.subr.bf16.mxu0 %v2500_v20  ;;  %v2564_v17 = vld [vmem:[#allocation5 + $0x2c0] ss:$8 sps:$4 sm:$0xff]   ;;  %v2575_v20 = vld [vmem:[#allocation5 + $0x3b4] ss:$8 sps:$4 sm:$0xff]  }
  0x8e   :  { %1129 = vmatprep.subr.bf16.mxu1 %v2503_v21  ;;  %v2570_v21 = vld [vmem:[#allocation5 + $0x2b0] ss:$8 sps:$4 sm:$0xff]  }
  0x8f   :  { %1039 = vmatmul.mubr.bf16.vlgmr.msra.gmra.mxu0 %v218_v22  ;;  %v2573_v22 = vld [vmem:[#allocation5 + $0x3b0] ss:$8 sps:$4 sm:$0xff]  }
  0x90   :  { %1080 = vmatmul.mubr.bf16.vlgmr.msra.gmra.mxu1 %v220_v23  ;;  %1089 = vmatpush1.bf16.msra.mxu0 %v2498_v24  ;;  %v2578_v23 = vld [vmem:[#allocation5 + $0x2a4] ss:$8 sps:$4 sm:$0xff]  }
  0x91   :  { %1130 = vmatpush1.bf16.msra.mxu1 %v2501_v25  ;;  %1090 = vmatprep.subr.bf16.mxu0 %v2506_v26  ;;  %v2581_v24 = vld [vmem:[#allocation5 + $0x3a4] ss:$8 sps:$4 sm:$0xff]   ;;  %v2576_v25 = vld [vmem:[#allocation5 + $0x2a0] ss:$8 sps:$4 sm:$0xff]  }
  0x92   :  { %1131 = vmatprep.subr.bf16.mxu1 %v2509_v27  ;;  %1120 = vmatprep.mubr.bf16.mxu0 %v223_v8  ;;  %v2579_v26 = vld [vmem:[#allocation5 + $0x3a0] ss:$8 sps:$4 sm:$0xff]   ;;  %v2584_v27 = vld [vmem:[#allocation5 + $0x294] ss:$8 sps:$4 sm:$0xff]  }
  0x93   :  { %1161 = vmatprep.mubr.bf16.mxu1 %v225_v9  ;;  %v2645_v8 = vld [vmem:[#allocation7 + $0x80] ss:$8 sps:$4 sm:$0xff]   ;;  %v2648_v9 = vld [vmem:[#allocation8 + $0x70] ss:$8 sps:$4 sm:$0xff]  }
  0x94   :  { %1091 = vmatpush1.bf16.msra.mxu0 %v2504_v28  ;;  %v2587_v28 = vld [vmem:[#allocation5 + $0x394] ss:$8 sps:$4 sm:$0xff]  }
  0x95   :  { %1132 = vmatpush1.bf16.msra.mxu1 %v2507_v29  ;;  %1092 = vmatprep.subr.bf16.mxu0 %v2512_v30  ;;  %v2582_v29 = vld [vmem:[#allocation5 + $0x290] ss:$8 sps:$4 sm:$0xff]  }
  0x96   :  { %1133 = vmatprep.subr.bf16.mxu1 %v2515_v31  ;;  %v2585_v30 = vld [vmem:[#allocation5 + $0x390] ss:$8 sps:$4 sm:$0xff]   ;;  %v2590_v31 = vld [vmem:[#allocation5 + $0x284] ss:$8 sps:$4 sm:$0xff]  }
  0x98   :  { %1093 = vmatpush1.bf16.msra.mxu0 %v2510_v32  ;;  %v2593_v32 = vld [vmem:[#allocation5 + $0x384] ss:$8 sps:$4 sm:$0xff]  }
  0x99   :  { %1134 = vmatpush1.bf16.msra.mxu1 %v2513_v33  ;;  %1094 = vmatprep.subr.bf16.mxu0 %v2518_v34  ;;  %v2588_v33 = vld [vmem:[#allocation5 + $0x280] ss:$8 sps:$4 sm:$0xff]  }
  0x9a   :  { %1135 = vmatprep.subr.bf16.mxu1 %v2521_v35  ;;  %v2591_v34 = vld [vmem:[#allocation5 + $0x380] ss:$8 sps:$4 sm:$0xff]   ;;  %v206_v35 = vcombine.low %v3026_v62, %v3029_v63  ;;  %v2630_v62 = vld [vmem:[#allocation7 + $0xd0] ss:$8 sps:$4 sm:$0xff]   ;;  %v2635_v63 = vld [vmem:[#allocation7 + $0xc4] ss:$8 sps:$4 sm:$0xff]  }
  0x9c   :  { %1095 = vmatpush1.bf16.msra.mxu0 %v2516_v36  ;;  %v208_v36 = vcombine.low %v3032_v0, %v3035_v1  ;;  %v2633_v0 = vld [vmem:[#allocation7 + $0xc0] ss:$8 sps:$4 sm:$0xff]   ;;  %v2638_v1 = vld [vmem:[#allocation7 + $0xb4] ss:$8 sps:$4 sm:$0xff]  }
  0x9d   :  { %1136 = vmatpush1.bf16.msra.mxu1 %v2519_v37  ;;  %1096 = vmatprep.subr.bf16.mxu0 %v2524_v38  ;;  %v222_v37 = vpack.c.bf16 %v206_v35, %v206_v35  ;;  %v2687_v35 = vld [vmem:[#allocation8 + $0xa0] ss:$8 sps:$4 sm:$0xff]  }
  0x9e   :  { %1137 = vmatprep.subr.bf16.mxu1 %v2527_v39  ;;  %v224_v38 = vpack.c.bf16 %v208_v36, %v208_v36  ;;  %v2600_v39 = vld [vmem:[#allocation7 + $0x70] ss:$8 sps:$4 sm:$0xff]  }
  0xa0   :  { %1097 = vmatpush1.bf16.msra.mxu0 %v2522_v40  ;;  %v2602_v40 = vld [vmem:[#allocation7 + $0x74] ss:$8 sps:$4 sm:$0xff]  }
  0xa1   :  { %1138 = vmatpush1.bf16.msra.mxu1 %v2525_v41  ;;  %1098 = vmatprep.subr.bf16.mxu0 %v2530_v42  ;;  %v2605_v41 = vld [vmem:[#allocation7 + $0x64] ss:$8 sps:$4 sm:$0xff]   ;;  %v2603_v42 = vld [vmem:[#allocation7 + $0x60] ss:$8 sps:$4 sm:$0xff]  }
  0xa2   :  { %1139 = vmatprep.subr.bf16.mxu1 %v2533_v43  ;;  %v2608_v43 = vld [vmem:[#allocation7 + $0x54] ss:$8 sps:$4 sm:$0xff]  }
  0xa4   :  { %1099 = vmatpush1.bf16.msra.mxu0 %v2528_v44  ;;  %v2606_v44 = vld [vmem:[#allocation7 + $0x50] ss:$8 sps:$4 sm:$0xff]  }
  0xa5   :  { %1140 = vmatpush1.bf16.msra.mxu1 %v2531_v45  ;;  %1100 = vmatprep.subr.bf16.mxu0 %v2536_v47  ;;  %v2611_v45 = vld [vmem:[#allocation7 + $0x44] ss:$8 sps:$4 sm:$0xff]   ;;  %v2609_v47 = vld [vmem:[#allocation7 + $0x40] ss:$8 sps:$4 sm:$0xff]  }
  0xa6   :  { %1141 = vmatprep.subr.bf16.mxu1 %v2539_v48  ;;  %v2614_v48 = vld [vmem:[#allocation7 + $0x34] ss:$8 sps:$4 sm:$0xff]  }
  0xa8   :  { %1101 = vmatpush1.bf16.msra.mxu0 %v2534_v49  ;;  %v2612_v49 = vld [vmem:[#allocation7 + $0x30] ss:$8 sps:$4 sm:$0xff]  }
  0xa9   :  { %1142 = vmatpush1.bf16.msra.mxu1 %v2537_v50  ;;  %1102 = vmatprep.subr.bf16.mxu0 %v2542_v51  ;;  %v2617_v50 = vld [vmem:[#allocation7 + $0x24] ss:$8 sps:$4 sm:$0xff]   ;;  %v2615_v51 = vld [vmem:[#allocation7 + $0x20] ss:$8 sps:$4 sm:$0xff]  }
  0xaa   :  { %1143 = vmatprep.subr.bf16.mxu1 %v2545_v52  ;;  %v2620_v52 = vld [vmem:[#allocation7 + $0x14] ss:$8 sps:$4 sm:$0xff]  }
  0xac   :  { %1103 = vmatpush1.bf16.msra.mxu0 %v2540_v56  ;;  %v2621_v56 = vld [vmem:[#allocation7] ss:$8 sps:$4 sm:$0xff]  }
  0xad   :  { %1144 = vmatpush1.bf16.msra.mxu1 %v2543_v57  ;;  %1104 = vmatprep.subr.bf16.mxu0 %v2548_v60  ;;  %v2626_v57 = vld [vmem:[#allocation7 + $0xf4] ss:$8 sps:$4 sm:$0xff]   ;;  %v2627_v60 = vld [vmem:[#allocation7 + $0xe0] ss:$8 sps:$4 sm:$0xff]  }
  0xae   :  { %1145 = vmatprep.subr.bf16.mxu1 %v2551_v61  ;;  %v2632_v61 = vld [vmem:[#allocation7 + $0xd4] ss:$8 sps:$4 sm:$0xff]  }
  0xb0   :  { %1105 = vmatpush2.bf16.msra.mxu0 %v2546_v3  ;;  %v2641_v3 = vld [vmem:[#allocation7 + $0xa4] ss:$8 sps:$4 sm:$0xff]  }
  0xb1   :  { %1146 = vmatpush2.bf16.msra.mxu1 %v2549_v4  ;;  %1106 = vmatprep.subr.bf16.mxu0 %v2554_v6  ;;  %v2639_v4 = vld [vmem:[#allocation7 + $0xa0] ss:$8 sps:$4 sm:$0xff]   ;;  %v2642_v6 = vld [vmem:[#allocation7 + $0x90] ss:$8 sps:$4 sm:$0xff]  }
  0xb2   :  { %1147 = vmatprep.subr.bf16.mxu1 %v2557_v7  ;;  %v2647_v7 = vld [vmem:[#allocation7 + $0x84] ss:$8 sps:$4 sm:$0xff]  }
  0xb4   :  { %1107 = vmatpush2.bf16.msra.mxu0 %v2552_v53  ;;  %v2650_v53 = vld [vmem:[#allocation8 + $0x74] ss:$8 sps:$4 sm:$0xff]  }
  0xb5   :  { %1148 = vmatpush2.bf16.msra.mxu1 %v2555_v10  ;;  %1108 = vmatprep.subr.bf16.mxu0 %v2560_v11  ;;  %v2653_v10 = vld [vmem:[#allocation8 + $0x64] ss:$8 sps:$4 sm:$0xff]   ;;  %v2651_v11 = vld [vmem:[#allocation8 + $0x60] ss:$8 sps:$4 sm:$0xff]  }
  0xb6   :  { %1149 = vmatprep.subr.bf16.mxu1 %v2563_v12  ;;  %v2656_v12 = vld [vmem:[#allocation8 + $0x54] ss:$8 sps:$4 sm:$0xff]  }
  0xb8   :  { %1109 = vmatpush2.bf16.msra.mxu0 %v2558_v13  ;;  %v2654_v13 = vld [vmem:[#allocation8 + $0x50] ss:$8 sps:$4 sm:$0xff]  }
  0xb9   :  { %1150 = vmatpush2.bf16.msra.mxu1 %v2561_v14  ;;  %1110 = vmatprep.subr.bf16.mxu0 %v2566_v15  ;;  %v2659_v14 = vld [vmem:[#allocation8 + $0x44] ss:$8 sps:$4 sm:$0xff]   ;;  %v2657_v15 = vld [vmem:[#allocation8 + $0x40] ss:$8 sps:$4 sm:$0xff]  }
  0xba   :  { %1151 = vmatprep.subr.bf16.mxu1 %v2569_v16  ;;  %v2662_v16 = vld [vmem:[#allocation8 + $0x34] ss:$8 sps:$4 sm:$0xff]  }
  0xbc   :  { %1111 = vmatpush2.bf16.msra.mxu0 %v2564_v17  ;;  %v2660_v17 = vld [vmem:[#allocation8 + $0x30] ss:$8 sps:$4 sm:$0xff]  }
  0xbd   :  { %1152 = vmatpush2.bf16.msra.mxu1 %v2567_v18  ;;  %1112 = vmatprep.subr.bf16.mxu0 %v2572_v19  ;;  %v2665_v18 = vld [vmem:[#allocation8 + $0x24] ss:$8 sps:$4 sm:$0xff]   ;;  %v2663_v19 = vld [vmem:[#allocation8 + $0x20] ss:$8 sps:$4 sm:$0xff]  }
  0xbe   :  { %1153 = vmatprep.subr.bf16.mxu1 %v2575_v20  ;;  %v2668_v20 = vld [vmem:[#allocation8 + $0x14] ss:$8 sps:$4 sm:$0xff]  }
  0xc0   :  { %1113 = vmatpush2.bf16.msra.mxu0 %v2570_v21  ;;  %v2666_v21 = vld [vmem:[#allocation8 + $0x10] ss:$8 sps:$4 sm:$0xff]  }
  0xc1   :  { %1154 = vmatpush2.bf16.msra.mxu1 %v2573_v22  ;;  %1114 = vmatprep.subr.bf16.mxu0 %v2578_v23  ;;  %v2671_v22 = vld [vmem:[#allocation8 + $0x4] ss:$8 sps:$4 sm:$0xff]   ;;  %v2669_v23 = vld [vmem:[#allocation8] ss:$8 sps:$4 sm:$0xff]  }
  0xc2   :  { %1155 = vmatprep.subr.bf16.mxu1 %v2581_v24  ;;  %v2674_v24 = vld [vmem:[#allocation8 + $0xf4] ss:$8 sps:$4 sm:$0xff]  }
  0xc4   :  { %1115 = vmatpush2.bf16.msra.mxu0 %v2576_v25  ;;  %v2672_v25 = vld [vmem:[#allocation8 + $0xf0] ss:$8 sps:$4 sm:$0xff]  }
  0xc5   :  { %1156 = vmatpush2.bf16.msra.mxu1 %v2579_v26  ;;  %1116 = vmatprep.subr.bf16.mxu0 %v2584_v27  ;;  %v2677_v26 = vld [vmem:[#allocation8 + $0xe4] ss:$8 sps:$4 sm:$0xff]   ;;  %v2675_v27 = vld [vmem:[#allocation8 + $0xe0] ss:$8 sps:$4 sm:$0xff]  }
  0xc6   :  { %1157 = vmatprep.subr.bf16.mxu1 %v2587_v28  ;;  %v2680_v28 = vld [vmem:[#allocation8 + $0xd4] ss:$8 sps:$4 sm:$0xff]  }
  0xc8   :  { %1117 = vmatpush2.bf16.msra.mxu0 %v2582_v29  ;;  %v2678_v29 = vld [vmem:[#allocation8 + $0xd0] ss:$8 sps:$4 sm:$0xff]  }
  0xc9   :  { %1158 = vmatpush2.bf16.msra.mxu1 %v2585_v30  ;;  %1118 = vmatprep.subr.bf16.mxu0 %v2590_v31  ;;  %v2683_v30 = vld [vmem:[#allocation8 + $0xc4] ss:$8 sps:$4 sm:$0xff]   ;;  %v2681_v31 = vld [vmem:[#allocation8 + $0xc0] ss:$8 sps:$4 sm:$0xff]  }
  0xca   :  { %1159 = vmatprep.subr.bf16.mxu1 %v2593_v32  ;;  %v2686_v32 = vld [vmem:[#allocation8 + $0xb4] ss:$8 sps:$4 sm:$0xff]  }
  0xcc   :  { %1119 = vmatpush2.bf16.msra.mxu0 %v2588_v33  ;;  %v2684_v33 = vld [vmem:[#allocation8 + $0xb0] ss:$8 sps:$4 sm:$0xff]  }
  0xcd   :  { %1160 = vmatpush2.bf16.msra.mxu1 %v2591_v34  ;;  %1378 = vmatprep.subr.bf16.mxu0 %v2602_v40  ;;  %v2689_v34 = vld [vmem:[#allocation8 + $0xa4] ss:$8 sps:$4 sm:$0xff]  }
  0xce   :  { %1627 = vmatprep.subr.bf16.mxu1 %v2650_v53  ;;  %v2696_v53 = vld [vmem:[#allocation10 + $0x70] ss:$8 sps:$4 sm:$0xff]  }
  0xcf   :  { %1121 = vmatmul.mubr.bf16.vlgmr.msra.gmra.mxu0 %v222_v37 }
  0xd0   :  { %1162 = vmatmul.mubr.bf16.vlgmr.msra.gmra.mxu1 %v224_v38  ;;  %1379 = vmatpush1.bf16.msra.mxu0 %v2600_v39 }
  0xd1   :  { %1380 = vmatprep.subr.bf16.mxu0 %v2605_v41  ;;  %1628 = vmatpush1.bf16.msra.mxu1 %v2648_v9  ;;  %v2693_v9 = vld [vmem:[#allocation8 + $0x80] ss:$8 sps:$4 sm:$0xff]  }
  0xd2   :  { %1629 = vmatprep.subr.bf16.mxu1 %v2653_v10  ;;  %v2698_v10 = vld [vmem:[#allocation10 + $0x74] ss:$8 sps:$4 sm:$0xff]  }
  0xd4   :  { %1381 = vmatpush1.bf16.msra.mxu0 %v2603_v42 }
  0xd5   :  { %1382 = vmatprep.subr.bf16.mxu0 %v2608_v43  ;;  %1630 = vmatpush1.bf16.msra.mxu1 %v2651_v11  ;;  %v2701_v11 = vld [vmem:[#allocation10 + $0x64] ss:$8 sps:$4 sm:$0xff]  }
  0xd6   :  { %1631 = vmatprep.subr.bf16.mxu1 %v2656_v12  ;;  %v2699_v12 = vld [vmem:[#allocation10 + $0x60] ss:$8 sps:$4 sm:$0xff]  }
  0xd8   :  { %1383 = vmatpush1.bf16.msra.mxu0 %v2606_v44  ;;  %v3046_v44 = vsub.s32 0, %v3016_v46 }
  0xd9   :  { %1384 = vmatprep.subr.bf16.mxu0 %v2611_v45  ;;  %1632 = vmatpush1.bf16.msra.mxu1 %v2654_v13  ;;  %v354_v45 = vld [vmem:[%s3079_s2] sm:$0x3]  ;;  %v2704_v13 = vld [vmem:[#allocation10 + $0x54] ss:$8 sps:$4 sm:$0xff]  }
  0xda   :  { %1633 = vmatprep.subr.bf16.mxu1 %v2659_v14  ;;  %v2702_v14 = vld [vmem:[#allocation10 + $0x50] ss:$8 sps:$4 sm:$0xff]  }
  0xdc   :  { %1385 = vmatpush1.bf16.msra.mxu0 %v2609_v47  ;;  %v3052_v47 = vsub.s32 1, %v3016_v46 }
  0xdd   :  { %1386 = vmatprep.subr.bf16.mxu0 %v2614_v48  ;;  %1634 = vmatpush1.bf16.msra.mxu1 %v2657_v15  ;;  %v359_v48 = vrot.slane %v354_v45, %v3046_v44  ;;  %v2707_v15 = vld [vmem:[#allocation10 + $0x44] ss:$8 sps:$4 sm:$0xff]  }
  0xde   :  { %1635 = vmatprep.subr.bf16.mxu1 %v2662_v16  ;;  %v2705_v16 = vld [vmem:[#allocation10 + $0x40] ss:$8 sps:$4 sm:$0xff]  }
  0xe0   :  { %1387 = vmatpush1.bf16.msra.mxu0 %v2612_v49  ;;  %v363_v49 = vrot.slane %v354_v45, %v3052_v47 }
  0xe1   :  { %1388 = vmatprep.subr.bf16.mxu0 %v2617_v50  ;;  %1636 = vmatpush1.bf16.msra.mxu1 %v2660_v17  ;;  %v2710_v17 = vld [vmem:[#allocation10 + $0x34] ss:$8 sps:$4 sm:$0xff]  }
  0xe2   :  { %1637 = vmatprep.subr.bf16.mxu1 %v2665_v18  ;;  %v2708_v18 = vld [vmem:[#allocation10 + $0x30] ss:$8 sps:$4 sm:$0xff]  }
  0xe4   :  { %1389 = vmatpush1.bf16.msra.mxu0 %v2615_v51 }
  0xe5   :  { %1390 = vmatprep.subr.bf16.mxu0 %v2620_v52  ;;  %1638 = vmatpush1.bf16.msra.mxu1 %v2663_v19  ;;  %v2713_v19 = vld [vmem:[#allocation10 + $0x24] ss:$8 sps:$4 sm:$0xff]  }
  0xe6   :  { %1639 = vmatprep.subr.bf16.mxu1 %v2668_v20  ;;  %v2711_v20 = vld [vmem:[#allocation10 + $0x20] ss:$8 sps:$4 sm:$0xff]  }
  0xe8   :  { %1391 = vmatpush1.bf16.msra.mxu0 %v2618_v54 }
  0xe9   :  { %1392 = vmatprep.subr.bf16.mxu0 %v2623_v55  ;;  %1640 = vmatpush1.bf16.msra.mxu1 %v2666_v21  ;;  %v2716_v21 = vld [vmem:[#allocation10 + $0x14] ss:$8 sps:$4 sm:$0xff]  }
  0xea   :  { %1641 = vmatprep.subr.bf16.mxu1 %v2671_v22  ;;  %v2714_v22 = vld [vmem:[#allocation10 + $0x10] ss:$8 sps:$4 sm:$0xff]  }
  0xec   :  { %1393 = vmatpush1.bf16.msra.mxu0 %v2621_v56 }
  0xed   :  { %1394 = vmatprep.subr.bf16.mxu0 %v2626_v57  ;;  %1642 = vmatpush1.bf16.msra.mxu1 %v2669_v23  ;;  %v2719_v23 = vld [vmem:[#allocation10 + $0x4] ss:$8 sps:$4 sm:$0xff]  }
  0xee   :  { %1643 = vmatprep.subr.bf16.mxu1 %v2674_v24  ;;  %v2717_v24 = vld [vmem:[#allocation10] ss:$8 sps:$4 sm:$0xff]  }
  0xf0   :  { %1395 = vmatpush2.bf16.msra.mxu0 %v2624_v58 }
  0xf1   :  { %1396 = vmatprep.subr.bf16.mxu0 %v2629_v59  ;;  %1644 = vmatpush2.bf16.msra.mxu1 %v2672_v25  ;;  %v2722_v25 = vld [vmem:[#allocation10 + $0xf4] ss:$8 sps:$4 sm:$0xff]  }
  0xf2   :  { %1645 = vmatprep.subr.bf16.mxu1 %v2677_v26  ;;  %v2720_v26 = vld [vmem:[#allocation10 + $0xf0] ss:$8 sps:$4 sm:$0xff]  }
  0xf4   :  { %1397 = vmatpush2.bf16.msra.mxu0 %v2627_v60 }
  0xf5   :  { %1398 = vmatprep.subr.bf16.mxu0 %v2632_v61  ;;  %1646 = vmatpush2.bf16.msra.mxu1 %v2675_v27  ;;  %v2725_v27 = vld [vmem:[#allocation10 + $0xe4] ss:$8 sps:$4 sm:$0xff]  }
  0xf6   :  { %1647 = vmatprep.subr.bf16.mxu1 %v2680_v28  ;;  %v2723_v28 = vld [vmem:[#allocation10 + $0xe0] ss:$8 sps:$4 sm:$0xff]  }
  0xf8   :  { %1399 = vmatpush2.bf16.msra.mxu0 %v2630_v62 }
  0xf9   :  { %1400 = vmatprep.subr.bf16.mxu0 %v2635_v63  ;;  %1648 = vmatpush2.bf16.msra.mxu1 %v2678_v29  ;;  %v2728_v29 = vld [vmem:[#allocation10 + $0xd4] ss:$8 sps:$4 sm:$0xff]  }
  0xfa   :  { %1649 = vmatprep.subr.bf16.mxu1 %v2683_v30  ;;  %v2726_v30 = vld [vmem:[#allocation10 + $0xd0] ss:$8 sps:$4 sm:$0xff]  }
  0xfc   :  { %1401 = vmatpush2.bf16.msra.mxu0 %v2633_v0 }
  0xfd   :  { %1402 = vmatprep.subr.bf16.mxu0 %v2638_v1  ;;  %1650 = vmatpush2.bf16.msra.mxu1 %v2681_v31  ;;  %v2731_v31 = vld [vmem:[#allocation10 + $0xc4] ss:$8 sps:$4 sm:$0xff]  }
  0xfe   :  { %1651 = vmatprep.subr.bf16.mxu1 %v2686_v32  ;;  %v2729_v32 = vld [vmem:[#allocation10 + $0xc0] ss:$8 sps:$4 sm:$0xff]  }
 0x100   :  { %1403 = vmatpush2.bf16.msra.mxu0 %v2636_v2 }
 0x101   :  { %1404 = vmatprep.subr.bf16.mxu0 %v2641_v3  ;;  %1652 = vmatpush2.bf16.msra.mxu1 %v2684_v33  ;;  %v2734_v33 = vld [vmem:[#allocation10 + $0xb4] ss:$8 sps:$4 sm:$0xff]  }
 0x102   :  { %1653 = vmatprep.subr.bf16.mxu1 %v2689_v34  ;;  %v2732_v34 = vld [vmem:[#allocation10 + $0xb0] ss:$8 sps:$4 sm:$0xff]  }
 0x104   :  { %1405 = vmatpush2.bf16.msra.mxu0 %v2639_v4 }
 0x105   :  { %1406 = vmatprep.subr.bf16.mxu0 %v2644_v5  ;;  %1654 = vmatpush2.bf16.msra.mxu1 %v2687_v35  ;;  %v2737_v35 = vld [vmem:[#allocation10 + $0xa4] ss:$8 sps:$4 sm:$0xff]  }
 0x108   :  { %1407 = vmatpush2.bf16.msra.mxu0 %v2642_v6  ;;  %v2692_v6 = vld [vmem:[#allocation8 + $0x94] ss:$8 sps:$4 sm:$0xff]  }
 0x109   :  { %1408 = vmatprep.subr.bf16.mxu0 %v2647_v7  ;;  %v2690_v7 = vld [vmem:[#allocation8 + $0x90] ss:$8 sps:$4 sm:$0xff]   ;;  %1655 = vmatprep.subr.bf16.mxu1 %v2692_v6 }
 0x10a   :  { %1656 = vmatpush2.bf16.msra.mxu1 %v2690_v7 }
 0x10c   :  { %1409 = vmatpush2.bf16.msra.mxu0 %v2645_v8  ;;  %v2695_v8 = vld [vmem:[#allocation8 + $0x84] ss:$8 sps:$4 sm:$0xff]  }
 0x10d   :  { %1657 = vmatprep.subr.bf16.mxu1 %v2695_v8  ;;  %1876 = vmatprep.subr.bf16.mxu0 %v2698_v10 }
 0x10e   :  { %1658 = vmatpush2.bf16.msra.mxu1 %v2693_v9 }
 0x14f   :  { %v1040_v36 = vpop.f32.mrf.mxu0 }
 0x150   :  { %v1081_v37 = vpop.f32.mrf.mxu1  ;;  %v1041_v50 = vadd.f32 %v1040_v36, %v359_v48  ;;  %v2735_v36 = vld [vmem:[#allocation10 + $0xa0] ss:$8 sps:$4 sm:$0xff]  }
 0x151   :  { %v1042_v38 = vpop.f32.mrf.mxu0 }
 0x152   :  { %v1083_v39 = vpop.f32.mrf.mxu1  ;;  %v1043_v51 = vadd.f32 %v1042_v38, %v363_v49  ;;  %v1082_v52 = vadd.f32 %v1081_v37, %v1041_v50  ;;  %v1206_v37 = vld [vmem:[%s3081_s4] sm:$0x3] }
 0x153   :  { %v1044_v40 = vpop.f32.mrf.mxu0  ;;  %v1211_v38 = vrot.slane %v1206_v37, %v3046_v44 }
 0x154   :  { %v1085_v41 = vpop.f32.mrf.mxu1  ;;  %v1084_v56 = vadd.f32 %v1083_v39, %v1043_v51  ;;  %v1215_v39 = vrot.slane %v1206_v37, %v3052_v47 }
 0x155   :  { %v1045_v42 = vpop.f32.mrf.mxu0 }
 0x156   :  { %v1086_v43 = vpop.f32.mrf.mxu1 }
 0x18f   :  { %v1122_v54 = vpop.f32.mrf.mxu0 }
 0x190   :  { %v1163_v55 = vpop.f32.mrf.mxu1  ;;  %v1123_v57 = vadd.f32 %v1122_v54, %v1082_v52  ;;  %v2740_v54 = vld [vmem:[#allocation10 + $0x94] ss:$8 sps:$4 sm:$0xff]  }
 0x191   :  { %v1124_v58 = vpop.f32.mrf.mxu0 }
 0x192   :  { %v1165_v59 = vpop.f32.mrf.mxu1  ;;  %v1164_v60 = vadd.f32 %v1163_v55, %v1123_v57  ;;  %v1125_v61 = vadd.f32 %v1124_v58, %v1084_v56  ;;  %v2738_v55 = vld [vmem:[#allocation10 + $0x90] ss:$8 sps:$4 sm:$0xff]   ;;  %v2743_v56 = vld [vmem:[#allocation10 + $0x84] ss:$8 sps:$4 sm:$0xff]   ;;  %v2741_v57 = vld [vmem:[#allocation10 + $0x80] ss:$8 sps:$4 sm:$0xff]  }
 0x193   :  { %v1126_v62 = vpop.f32.mrf.mxu0  ;;  %v2744_v58 = vld [vmem:[#allocation11 + $0x78] sm:$0xff]  }
 0x194   :  { %v1167_v63 = vpop.f32.mrf.mxu1  ;;  %v1166_v0 = vadd.f32 %v1165_v59, %v1125_v61  ;;  %v1170_v46 = vmax.f32 %v1164_v60, 0.0  ;;  %v2745_v59 = vld [vmem:[#allocation11 + $0x38] sm:$0xff]   ;;  %v2746_v60 = vld [vmem:[#allocation11 + $0x70] sm:$0xff]   ;;  %2358 = vmatprep.subr.bf16.mxu1 %v2744_v58  ;;  %v2748_v62 = vld [vmem:[#allocation11 + $0x68] sm:$0xff]  }
 0x195   :  { %v1127_v1 = vpop.f32.mrf.mxu0  ;;  %v2747_v61 = vld [vmem:[#allocation11 + $0x30] sm:$0xff]   ;;  %v2749_v63 = vld [vmem:[#allocation11 + $0x28] sm:$0xff]  }
 0x196   :  { %v1168_v2 = vpop.f32.mrf.mxu1  ;;  %v1171_v3 = vmax.f32 %v1166_v0, 0.0  ;;  %v1172_v5 = vpack.c.bf16 %v1170_v46, %v1170_v46  ;;  %v2750_v0 = vld [vmem:[#allocation11 + $0x60] sm:$0xff]   ;;  %v2752_v1 = vld [vmem:[#allocation11 + $0x58] sm:$0xff]  }
 0x197   :  { %v2751_v46 = vld [vmem:[#allocation11 + $0x20] sm:$0xff]   ;;  %v2753_v2 = vld [vmem:[#allocation11 + $0x18] sm:$0xff]  }
 0x198   :  { %v1173_v4 = vpack.c.bf16 %v1171_v3, %v1171_v3  ;;  %v2754_v3 = vld [vmem:[#allocation11 + $0x50] sm:$0xff]  }
 0x19a   :  { %1410 = vmatprep.mubr.bf16.mxu0 %v1173_v4  ;;  %v2755_v4 = vld [vmem:[#allocation11 + $0x10] sm:$0xff]  }
 0x19b   :  { %1411 = vmatmul.mubr.bf16.vlgmr.msra.gmra.mxu0 %v1172_v5  ;;  %v1455_v5 = vld [vmem:[%s3083_s6] sm:$0x3] }
 0x19c   :  { %1877 = vmatpush1.bf16.msra.mxu0 %v2696_v53  ;;  %v1460_v6 = vrot.slane %v1455_v5, %v3046_v44  ;;  %v1464_v7 = vrot.slane %v1455_v5, %v3052_v47 }
 0x19d   :  { %1878 = vmatprep.subr.bf16.mxu0 %v2701_v11 }
 0x1a0   :  { %1879 = vmatpush1.bf16.msra.mxu0 %v2699_v12 }
 0x1a1   :  { %1880 = vmatprep.subr.bf16.mxu0 %v2704_v13 }
 0x1a4   :  { %1881 = vmatpush1.bf16.msra.mxu0 %v2702_v14 }
 0x1a5   :  { %1882 = vmatprep.subr.bf16.mxu0 %v2707_v15 }
 0x1a8   :  { %1883 = vmatpush1.bf16.msra.mxu0 %v2705_v16 }
 0x1a9   :  { %1884 = vmatprep.subr.bf16.mxu0 %v2710_v17  ;;  %v2756_v17 = vld [vmem:[#allocation11 + $0x48] sm:$0xff]  }
 0x1ac   :  { %1885 = vmatpush1.bf16.msra.mxu0 %v2708_v18  ;;  %v2757_v18 = vld [vmem:[#allocation11 + $0x8] sm:$0xff]  }
 0x1ad   :  { %1886 = vmatprep.subr.bf16.mxu0 %v2713_v19  ;;  %v2758_v19 = vld [vmem:[#allocation11 + $0x40] sm:$0xff]  }
 0x1b0   :  { %1887 = vmatpush1.bf16.msra.mxu0 %v2711_v20  ;;  %v2759_v20 = vld [vmem:[#allocation11] sm:$0xff]  }
 0x1b1   :  { %1888 = vmatprep.subr.bf16.mxu0 %v2716_v21  ;;  %v1704_v21 = vld [vmem:[%s3085_s8] sm:$0x3] }
 0x1b4   :  { %1889 = vmatpush1.bf16.msra.mxu0 %v2714_v22  ;;  %v1709_v22 = vrot.slane %v1704_v21, %v3046_v44 }
 0x1b5   :  { %1890 = vmatprep.subr.bf16.mxu0 %v2719_v23  ;;  %v1713_v23 = vrot.slane %v1704_v21, %v3052_v47 }
 0x1b8   :  { %1891 = vmatpush1.bf16.msra.mxu0 %v2717_v24 }
 0x1b9   :  { %1892 = vmatprep.subr.bf16.mxu0 %v2722_v25 }
 0x1bc   :  { %1893 = vmatpush2.bf16.msra.mxu0 %v2720_v26 }
 0x1bd   :  { %1894 = vmatprep.subr.bf16.mxu0 %v2725_v27 }
 0x1c0   :  { %1895 = vmatpush2.bf16.msra.mxu0 %v2723_v28 }
 0x1c1   :  { %1896 = vmatprep.subr.bf16.mxu0 %v2728_v29 }
 0x1c4   :  { %1897 = vmatpush2.bf16.msra.mxu0 %v2726_v30 }
 0x1c5   :  { %1898 = vmatprep.subr.bf16.mxu0 %v2731_v31 }
 0x1c8   :  { %1899 = vmatpush2.bf16.msra.mxu0 %v2729_v32 }
 0x1c9   :  { %1900 = vmatprep.subr.bf16.mxu0 %v2734_v33 }
 0x1cc   :  { %1901 = vmatpush2.bf16.msra.mxu0 %v2732_v34 }
 0x1cd   :  { %1902 = vmatprep.subr.bf16.mxu0 %v2737_v35  ;;  %v2341_v35 = vld [vmem:[%s3087_s10] ss:$0 sm:$0xff] }
 0x1d0   :  { %1903 = vmatpush2.bf16.msra.mxu0 %v2735_v36 }
 0x1d1   :  { %1904 = vmatprep.subr.bf16.mxu0 %v2740_v54 }
 0x1d4   :  { %1905 = vmatpush2.bf16.msra.mxu0 %v2738_v55 }
 0x1d5   :  { %1906 = vmatprep.subr.bf16.mxu0 %v2743_v56 }
 0x1d8   :  { %1907 = vmatpush2.bf16.msra.mxu0 %v2741_v57 }
 0x25b   :  { %v1412_v40 = vpop.f32.mrf.mxu0 }
 0x25c   :  { %v1413_v41 = vadd.f32 %v1412_v40, %v1211_v38 }
 0x25d   :  { %v1414_v42 = vpop.f32.mrf.mxu0 }
 0x25e   :  { %v1415_v43 = vadd.f32 %v1414_v42, %v1215_v39  ;;  %v1419_v45 = vmax.f32 %v1413_v41, 0.0 }
 0x25f   :  { %v1416_v48 = vpop.f32.mrf.mxu0 }
 0x260   :  { %v1420_v49 = vmax.f32 %v1415_v43, 0.0  ;;  %v1421_v52 = vpack.c.bf16 %v1419_v45, %v1419_v45 }
 0x261   :  { %v1417_v50 = vpop.f32.mrf.mxu0 }
 0x262   :  { %v1422_v51 = vpack.c.bf16 %v1420_v49, %v1420_v49 }
 0x264   :  { %1659 = vmatprep.mubr.bf16.mxu1 %v1422_v51 }
 0x265   :  { %1660 = vmatmul.mubr.bf16.vlgmr.msra.gmra.mxu1 %v1421_v52 }
 0x266   :  { %2359 = vmatpush3.bf16.msra.mxu1 %v2745_v59 }
 0x267   :  { %2360 = vmatprep.subr.bf16.mxu1 %v2746_v60 }
 0x26a   :  { %2361 = vmatpush3.bf16.msra.mxu1 %v2747_v61 }
 0x26b   :  { %2362 = vmatprep.subr.bf16.mxu1 %v2748_v62 }
 0x26e   :  { %2363 = vmatpush3.bf16.msra.mxu1 %v2749_v63 }
 0x26f   :  { %2364 = vmatprep.subr.bf16.mxu1 %v2750_v0 }
 0x272   :  { %2365 = vmatpush3.bf16.msra.mxu1 %v2751_v46 }
 0x273   :  { %2366 = vmatprep.subr.bf16.mxu1 %v2752_v1 }
 0x276   :  { %2367 = vmatpush3.bf16.msra.mxu1 %v2753_v2 }
 0x277   :  { %2368 = vmatprep.subr.bf16.mxu1 %v2754_v3 }
 0x27a   :  { %2369 = vmatpush3.bf16.msra.mxu1 %v2755_v4 }
 0x27b   :  { %2370 = vmatprep.subr.bf16.mxu1 %v2756_v17 }
 0x27e   :  { %2371 = vmatpush3.bf16.msra.mxu1 %v2757_v18 }
 0x27f   :  { %2372 = vmatprep.subr.bf16.mxu1 %v2758_v19 }
 0x282   :  { %2373 = vmatpush3.bf16.msra.mxu1 %v2759_v20 }
 0x325   :  { %v1661_v8 = vpop.f32.mrf.mxu1 }
 0x326   :  { %v1662_v9 = vadd.f32 %v1661_v8, %v1460_v6 }
 0x327   :  { %v1663_v53 = vpop.f32.mrf.mxu1 }
 0x328   :  { %v1664_v10 = vadd.f32 %v1663_v53, %v1464_v7  ;;  %v1668_v11 = vmax.f32 %v1662_v9, 0.0 }
 0x329   :  { %v1665_v12 = vpop.f32.mrf.mxu1 }
 0x32a   :  { %v1669_v13 = vmax.f32 %v1664_v10, 0.0  ;;  %v1670_v16 = vpack.c.bf16 %v1668_v11, %v1668_v11 }
 0x32b   :  { %v1666_v14 = vpop.f32.mrf.mxu1 }
 0x32c   :  { %v1671_v15 = vpack.c.bf16 %v1669_v13, %v1669_v13 }
 0x32e   :  { %1908 = vmatprep.mubr.bf16.mxu0 %v1671_v15 }
 0x32f   :  { %1909 = vmatmul.mubr.bf16.vlgmr.msra.gmra.mxu0 %v1670_v16 }
 0x3ef   :  { %v1910_v24 = vpop.f32.mrf.mxu0 }
 0x3f0   :  { %v1911_v25 = vadd.f32 %v1910_v24, %v1709_v22 }
 0x3f1   :  { %v1912_v26 = vpop.f32.mrf.mxu0 }
 0x3f2   :  { %v1913_v27 = vadd.f32 %v1912_v26, %v1713_v23  ;;  %v1917_v28 = vmax.f32 %v1911_v25, 0.0 }
 0x3f3   :  { %v1914_v29 = vpop.f32.mrf.mxu0 }
 0x3f4   :  { %v1918_v30 = vmax.f32 %v1913_v27, 0.0  ;;  %v1919_v33 = vpack.c.bf16 %v1917_v28, %v1917_v28 }
 0x3f5   :  { %v1915_v31 = vpop.f32.mrf.mxu0 }
 0x3f6   :  { %v1920_v32 = vpack.c.bf16 %v1918_v30, %v1918_v30 }
 0x3f8   :  { %2088 = vmatprep.mubr.bf16.mxu1 %v1920_v32 }
 0x3f9   :  { %2089 = vmatmul.mubr.bf16.vlgmr.msra.gmra.mxu1 %v1919_v33 }
 0x4b9   :  { %v2374_v34 = vpop.f32.mrf.mxu1 }
 0x4bb   :  { %v2375_v44 = vpop.f32.mrf.mxu1 }
 0x4bc   :  { %v2376_v36 = vadd.f32 %v2375_v44, %v2374_v34 }
 0x4bd   :  { %v2377_v47 = vpop.f32.mrf.mxu1 }
 0x4be   :  { %v2091_v37 = vadd.f32 %v2376_v36, %v2341_v35 }
 0x4bf   :  { %v2378_v38 = vpop.f32.mrf.mxu1 }
 0x4c0   :  { %2096 = vst [vmem:[#allocation13] sm:$0xff] %v2091_v37 }
 0x4c1   :  { %2101 = vsyncadd [#allocation4], 96  ;;  %s2923_s8 = smov [#allocation13]  }
 0x4c2   :  { %s2102_s16 = sshll.u32 %s2923_s8, 4  ;;  %s2103_s16 = int_to_ptr.vmem [resolvable:$true] %s2102_s16 }
 0x4c3   :  { %s2880_s17 = scalar_lea.vmem %s2103_s16, 32  ;;  %s2884_s18 = scalar_lea.vmem %s2103_s16, 128 }
 0x4c4   :  { %p2881_p2 = scmp.ne.s32.totalorder %s2103_s16, %s2880_s17  ;;  %p2885_p3 = scmp.lt.s32.totalorder %s2103_s16, %s2103_s16 }
 0x4c5   :  { %p2886_p4 = scmp.lt.s32.totalorder %s2884_s18, %s2880_s17 }
 0x4c7   :  { %p2887_p5 = por %p2886_p4, %p2885_p3 }
 0x4c9   :  { %p2888_p6 = pnand %p2887_p5, %p2881_p2 }
 0x4cb   :  { %2891 = shalt.err (!%p2888_p6)
}
 0x4cc   :  { %s2924_s19 = smov 32   ;;  %s2925_s10 = smov 2  }
 0x4cd   :  { %2108 = dma.vmem_to_hbm [thread:$0]  %s2103_s16, 32, %s3088_s11, [#allocation4], %s2924_s19, %s2924_s19, %s2925_s10  }
 0x4ce   :  { %2908 = dma.done.wait [#allocation4], 128  }
 0x4cf   :  { %2909 = vsyncadd [#allocation4], 4294967168 }
 0x4d0   :  { %2112 = vsyncpa [#allocation3], 1 }
 0x4d1   :  { %2113 = vsyncpa [#allocation6], 1 }
 0x4d2   :  { %2114 = vsyncpa [#allocation9], 1 }
 0x4d3   :  { %2115 = vsyncpa [#allocation12], 1 }
 0x4d4   :  { %2116 = vsyncpa [#allocation4], 1 }

</bundles_post_ra>
